<compile_context>
chip_gen: v6e
topology: v6e:2x2x1
jax: 0.10.0
libtpu: 0.0.40
codegen_flags: <defaults>
</compile_context>

<pallas_src>
import math

import jax
import jax.numpy as jnp
from jax import lax
from jax.experimental import pallas as pl
from jax.experimental.pallas import tpu as pltpu


def _rnd(v, m):
    return ((v + m - 1) // m) * m


# ---------------------------------------------------------------------------
# Fused Pallas forward
# ---------------------------------------------------------------------------
def decoder_block_forward(x_nchw, skip_nchw, params):
    """x: (N, in_c, Hi, Wi), skip: (N, out_c, 2*Hi+1, 2*Wi+1) -> (N, out_c, 2*Hi+1, 2*Wi+1)."""
    x = x_nchw.astype(jnp.float32)
    skip = skip_nchw.astype(jnp.float32)
    N, Cin, Hi, Wi = x.shape
    Cout = params["wt"].shape[1]
    Ho, Wo = 2 * Hi + 1, 2 * Wi + 1
    assert skip.shape == (N, Cout, Ho, Wo), skip.shape

    C8o = _rnd(Cout, 8)                      # sublane-padded channel counts
    C8i = _rnd(Cin, 8)

    # Shared flattened layout.  Chained placements:
    #   conv2 input rectangle at (0,0), conv1 input at (1,1), up-conv input at (2,2),
    # so each stage's flat output (starting at index 0) is already the next stage's padded input.
    W = Wo + 4
    L2 = _rnd(Ho * W, 128)                   # conv2 / final output flat length (lane dense)
    L1 = _rnd(L2 + 2 * W + 2, 128)           # conv1 output length == h scratch length
    LA = _rnd(L1 + 2 * W + 2, 128)           # up-conv output length == u scratch length
    LX = LA + 2 * W + 2                      # flat extent the up-conv reads from padded x
    HX = -(-LX // W)                         # rows of the padded x buffer
    LS = L1 + 2 * W + 2                      # flat extent conv1 reads from padded skip
    HS = -(-LS // W)

    zero = jnp.zeros((), jnp.float32)
    # stride-2 dilation + halo padding of x on the host (one lax.pad with interior padding).
    xd = lax.pad(x, zero, ((0, 0, 0), (0, C8i - Cin, 0),
                           (4, HX - Ho - 2, 1), (4, 2, 1)))
    assert xd.shape == (N, C8i, HX, W), xd.shape
    xd = xd.reshape(N, C8i, HX * W)

    skp = lax.pad(skip, zero, ((0, 0, 0), (0, C8o - Cout, 0),
                               (2, HS - Ho - 2, 0), (2, 2, 0)))
    assert skp.shape == (N, C8o, HS, W), skp.shape
    skp = skp.reshape(N, C8o, HS * W)

    # ---- weights: per-tap (9, Cout_pad, Cin_pad) matrices, BN scale folded into the rows ----
    def per_tap(w_oihw, co, ci, row_scale=None):
        o, i = w_oihw.shape[0], w_oihw.shape[1]
        w = w_oihw.astype(jnp.float32)
        if row_scale is not None:
            w = w * row_scale.reshape(o, 1, 1, 1).astype(jnp.float32)
        w = jnp.pad(w, ((0, co - o), (0, ci - i), (0, 0), (0, 0)))
        return jnp.transpose(w, (2, 3, 0, 1)).reshape(9, co, ci)     # tap t = ky*3 + kx

    k_up = jnp.flip(params["wt"], (2, 3)).transpose(1, 0, 2, 3)      # (out_c, in_c, 3, 3)
    wup = per_tap(k_up, C8o, C8i)
    # conv1 split into its "up" half and "skip" half (concat order is [up, skip]).
    w1u = per_tap(params["w1"][:, :Cout], C8o, C8o, params["scale1"])
    w1s = per_tap(params["w1"][:, Cout:], C8o, C8o, params["scale1"])
    w2m = per_tap(params["w2"], C8o, C8o, params["scale2"])

    def colvec(v):
        return jnp.pad(v.astype(jnp.float32), (0, C8o - Cout)).reshape(C8o, 1)

    bup = colvec(params["bt"])
    b1v = colvec(params["bias1"])
    b2v = colvec(params["bias2"])

    # 1.0 exactly on the real output positions of a stage, 0.0 on halo rings / wrap columns.
    def rect_mask(Lm, r0, r1, c0, c1):
        idx = jnp.arange(Lm, dtype=jnp.int32)
        r, c = idx // W, idx % W
        m = (r >= r0) & (r < r1) & (c >= c0) & (c < c1)
        return m.astype(jnp.float32).reshape(1, Lm)

    mA = rect_mask(LA, 2, Ho + 2, 2, Wo + 2)   # up-conv real outputs
    mB = rect_mask(L1, 1, Ho + 1, 1, Wo + 1)   # conv1 real outputs

    tap_off = tuple(ky * W + kx for ky in range(3) for kx in range(3))

    def kernel(xd_ref, skp_ref, wup_ref, w1u_ref, w1s_ref, w2_ref,
               bup_ref, b1_ref, b2_ref, mA_ref, mB_ref, y_ref, ubuf, hbuf):

        def conv3x3(slicer, w_ref, Lout, acc=None):
            # 9 accumulating per-tap matmuls (static unroll); no im2col patch materialized.
            for t in range(9):
                part = jnp.dot(w_ref[t], slicer(tap_off[t], Lout),
                               preferred_element_type=jnp.float32)
                acc = part if acc is None else acc + part
            return acc

        # --- up: ConvTranspose2d as valid conv over the pre-dilated, halo-padded x ---
        u = conv3x3(lambda o, l: xd_ref[0, :, o:o + l], wup_ref, LA) + bup_ref[...]
        ubuf[...] = u * mA_ref[...]            # lands directly in conv1's padded layout

        # --- conv1 over concat([up, skip]) + folded BN1 + tanh (skip read in place) ---
        h = conv3x3(lambda o, l: ubuf[:, o:o + l], w1u_ref, L1)
        h = conv3x3(lambda o, l: skp_ref[0, :, o:o + l], w1s_ref, L1, acc=h)
        h = jnp.tanh(h + b1_ref[...])
        hbuf[...] = h * mB_ref[...]            # lands directly in conv2's padded layout

        # --- conv2 + folded BN2 + tanh; output block is (8, mult-of-128) dense ---
        y = conv3x3(lambda o, l: hbuf[:, o:o + l], w2_ref, L2)
        y_ref[0] = jnp.tanh(y + b2_ref[...])

    per_n3 = lambda n: (n, 0, 0)
    c3 = lambda n: (0, 0, 0)
    c2 = lambda n: (0, 0)

    grid_spec = pltpu.PrefetchScalarGridSpec(
        num_scalar_prefetch=0,
        grid=(N,),
        in_specs=[
            pl.BlockSpec((1, C8i, HX * W), per_n3),     # dilated + halo-padded x
            pl.BlockSpec((1, C8o, HS * W), per_n3),     # halo-padded skip (read in place)
            pl.BlockSpec((9, C8o, C8i), c3),            # up-conv weights, per tap
            pl.BlockSpec((9, C8o, C8o), c3),            # conv1 "up half"  (BN1 folded)
            pl.BlockSpec((9, C8o, C8o), c3),            # conv1 "skip half" (BN1 folded)
            pl.BlockSpec((9, C8o, C8o), c3),            # conv2 weights    (BN2 folded)
            pl.BlockSpec((C8o, 1), c2),                 # up bias
            pl.BlockSpec((C8o, 1), c2),                 # conv1 bias (BN1 folded)
            pl.BlockSpec((C8o, 1), c2),                 # conv2 bias (BN2 folded)
            pl.BlockSpec((1, LA), c2),                  # up output mask
            pl.BlockSpec((1, L1), c2),                  # conv1 output mask
        ],
        out_specs=pl.BlockSpec((1, C8o, L2), per_n3),
        scratch_shapes=[pltpu.VMEM((C8o, LA), jnp.float32),   # masked up output  (u)
                        pltpu.VMEM((C8o, L1), jnp.float32)],  # masked conv1 output (h)
    )

    out_flat = pl.pallas_call(
        kernel,
        out_shape=jax.ShapeDtypeStruct((N, C8o, L2), jnp.float32),
        grid_spec=grid_spec,
        compiler_params=pltpu.CompilerParams(dimension_semantics=("parallel",)),
    )(xd, skp, wup, w1u, w1s, w2m, bup, b1v, b2v, mA, mB)

    # crop the channel / lane padding and the wrap-around columns -> NCHW output
    out = out_flat[:, :Cout, :Ho * W].reshape(N, Cout, Ho, W)
    return out[:, :, :, :Wo]


# ---------------------------------------------------------------------------
# Deterministic synthetic parameters (PyTorch-shaped)
# ---------------------------------------------------------------------------
def init_params(key, in_c, out_c, disable_bn=False, eps=1e-5):
    ks = jax.random.split(key, 14)

    def uni(k, shape, fan_in):
        b = 1.0 / math.sqrt(fan_in)
        return jax.random.uniform(k, shape, jnp.float32, -b, b)

    wt = uni(ks[0], (in_c, out_c, 3, 3), in_c * 9)            # ConvTranspose2d weight (I, O, kh, kw)
    bt = uni(ks[1], (out_c,), in_c * 9)
    w1 = uni(ks[2], (out_c, 2 * out_c, 3, 3), 2 * out_c * 9)  # Conv2d OIHW
    b1 = uni(ks[3], (out_c,), 2 * out_c * 9)
    w2 = uni(ks[4], (out_c, out_c, 3, 3), out_c * 9)
    b2 = uni(ks[5], (out_c,), out_c * 9)

    def bn(kg, kb, km, kv):
        g = 1.0 + 0.1 * jax.random.normal(kg, (out_c,), jnp.float32)
        bta = 0.1 * jax.random.normal(kb, (out_c,), jnp.float32)
        m = 0.1 * jax.random.normal(km, (out_c,), jnp.float32)
        v = 0.5 + 0.1 * jnp.abs(jax.random.normal(kv, (out_c,), jnp.float32))
        return g, bta, m, v

    p = dict(wt=wt, bt=bt, w1=w1, b1=b1, w2=w2, b2=b2, disable_bn=disable_bn, eps=eps)
    if disable_bn:
        p.update(scale1=jnp.ones((out_c,), jnp.float32), bias1=b1,
                 scale2=jnp.ones((out_c,), jnp.float32), bias2=b2)
    else:
        g1, be1, m1, v1 = bn(ks[6], ks[7], ks[8], ks[9])
        g2, be2, m2, v2 = bn(ks[10], ks[11], ks[12], ks[13])
        s1 = g1 / jnp.sqrt(v1 + eps)
        s2 = g2 / jnp.sqrt(v2 + eps)
        p.update(g1=g1, beta1=be1, m1=m1, v1=v1, g2=g2, beta2=be2, m2=m2, v2=v2,
                 scale1=s1, bias1=(b1 - m1) * s1 + be1,
                 scale2=s2, bias2=(b2 - m2) * s2 + be2)
    return p


# ---------------------------------------------------------------------------
# Pure-JAX reference (correctness check only)
# ---------------------------------------------------------------------------
def reference_forward(x, skip, p):
    x = x.astype(jnp.float32)
    skip = skip.astype(jnp.float32)
    dn = ("NCHW", "OIHW", "NCHW")

    k_up = jnp.flip(p["wt"], (2, 3)).transpose(1, 0, 2, 3)
    u = lax.conv_general_dilated(x, k_up, (1, 1), ((2, 2), (2, 2)),
                                 lhs_dilation=(2, 2), dimension_numbers=dn)
    u = u + p["bt"][None, :, None, None]
    c = jnp.concatenate([u, skip], axis=1)

    def stage(inp, w, b, g, bta, m, v):
        y = lax.conv_general_dilated(inp, w, (1, 1), ((1, 1), (1, 1)), dimension_numbers=dn)
        y = y + b[None, :, None, None]
        if g is not None:
            y = (y - m[None, :, None, None]) * (g / jnp.sqrt(v + p["eps"]))[None, :, None, None] \
                + bta[None, :, None, None]
        return jnp.tanh(y)

    if p["disable_bn"]:
        h = stage(c, p["w1"], p["b1"], None, None, None, None)
        y = stage(h, p["w2"], p["b2"], None, None, None, None)
    else:
        h = stage(c, p["w1"], p["b1"], p["g1"], p["beta1"], p["m1"], p["v1"])
        y = stage(h, p["w2"], p["b2"], p["g2"], p["beta2"], p["m2"], p["v2"])
    return y


if __name__ == "__main__":
    N, in_c, out_c, Hi, Wi = 2, 8, 4, 8, 8
    Ho, Wo = 2 * Hi + 1, 2 * Wi + 1            # ConvTranspose2d(k=3, s=2, p=0) output size

    root = jax.random.PRNGKey(0)
    kx, ks, kp = jax.random.split(root, 3)
    x = jax.random.normal(kx, (N, in_c, Hi, Wi), jnp.float32)       # NCHW, like PyTorch
    skip = jax.random.normal(ks, (N, out_c, Ho, Wo), jnp.float32)
    params = init_params(kp, in_c, out_c, disable_bn=False)

    y = decoder_block_forward(x, skip, params)
    jax.block_until_ready(y)
    assert y.shape == (N, out_c, Ho, Wo), y.shape

    y_ref = reference_forward(x, skip, params)
    err = float(jnp.max(jnp.abs(y - y_ref)))
    assert bool(jnp.allclose(y, y_ref, atol=2e-2, rtol=2e-2)), f"max abs err {err}"

    print("KERNEL_OK")
</pallas_src>

<mosaic_0001>
module attributes {stable_mosaic.version = 11 : i64} {
  func.func @kernel(%arg0: i32, %arg1: memref<1x8x693xf32, #tpu.memory_space<vmem>>, %arg2: memref<1x8x567xf32, #tpu.memory_space<vmem>>, %arg3: memref<9x8x8xf32, #tpu.memory_space<vmem>>, %arg4: memref<9x8x8xf32, #tpu.memory_space<vmem>>, %arg5: memref<9x8x8xf32, #tpu.memory_space<vmem>>, %arg6: memref<9x8x8xf32, #tpu.memory_space<vmem>>, %arg7: memref<8x1xf32, #tpu.memory_space<vmem>>, %arg8: memref<8x1xf32, #tpu.memory_space<vmem>>, %arg9: memref<8x1xf32, #tpu.memory_space<vmem>>, %arg10: memref<1x640xf32, #tpu.memory_space<vmem>>, %arg11: memref<1x512xf32, #tpu.memory_space<vmem>>, %arg12: memref<1x8x384xf32, #tpu.memory_space<vmem>>, %arg13: memref<8x640xf32, #tpu.memory_space<vmem>>, %arg14: memref<8x512xf32, #tpu.memory_space<vmem>>) attributes {dimension_semantics = [#tpu.dimension_semantics<parallel>], iteration_bounds = array<i64: 2>, scalar_prefetch = 0 : i64, scratch_operands = 2 : i64, tpu.core_type = #tpu.core_type<tc>, window_params = [{transform_indices = @transform_0, window_bounds = array<i64: 1, 8, 693>}, {transform_indices = @transform_1, window_bounds = array<i64: 1, 8, 567>}, {pipeline_mode = #tpu.pipeline_mode<synchronous>, transform_indices = @transform_2, window_bounds = array<i64: 9, 8, 8>}, {pipeline_mode = #tpu.pipeline_mode<synchronous>, transform_indices = @transform_3, window_bounds = array<i64: 9, 8, 8>}, {pipeline_mode = #tpu.pipeline_mode<synchronous>, transform_indices = @transform_4, window_bounds = array<i64: 9, 8, 8>}, {pipeline_mode = #tpu.pipeline_mode<synchronous>, transform_indices = @transform_5, window_bounds = array<i64: 9, 8, 8>}, {pipeline_mode = #tpu.pipeline_mode<synchronous>, transform_indices = @transform_6, window_bounds = array<i64: 8, 1>}, {pipeline_mode = #tpu.pipeline_mode<synchronous>, transform_indices = @transform_7, window_bounds = array<i64: 8, 1>}, {pipeline_mode = #tpu.pipeline_mode<synchronous>, transform_indices = @transform_8, window_bounds = array<i64: 8, 1>}, {pipeline_mode = #tpu.pipeline_mode<synchronous>, transform_indices = @transform_9, window_bounds = array<i64: 1, 640>}, {pipeline_mode = #tpu.pipeline_mode<synchronous>, transform_indices = @transform_10, window_bounds = array<i64: 1, 512>}, {transform_indices = @transform_11, window_bounds = array<i64: 1, 8, 384>}]} {
    %c0 = arith.constant 0 : index
    %c0_0 = arith.constant 0 : index
    %c0_1 = arith.constant 0 : index
    %0 = vector.load %arg3[%c0, %c0_0, %c0_1] : memref<9x8x8xf32, #tpu.memory_space<vmem>>, vector<1x8x8xf32>
    %1 = vector.shape_cast %0 : vector<1x8x8xf32> to vector<8x8xf32>
    %c0_2 = arith.constant 0 : index
    %c0_3 = arith.constant 0 : index
    %c0_4 = arith.constant 0 : index
    %2 = vector.load %arg1[%c0_2, %c0_3, %c0_4] : memref<1x8x693xf32, #tpu.memory_space<vmem>>, vector<1x8x640xf32>
    %3 = vector.shape_cast %2 : vector<1x8x640xf32> to vector<8x640xf32>
    %cst = arith.constant dense<0.000000e+00> : vector<8x640xf32>
    %4 = tpu.matmul %1, %3, %cst {dimension_numbers = #tpu.dot_dimension_numbers<[1], [0], [0], [1], [0, 0, 1, 1], [], []>} : vector<8x8xf32>, vector<8x640xf32>, vector<8x640xf32> -> vector<8x640xf32>
    %c1 = arith.constant 1 : index
    %c0_5 = arith.constant 0 : index
    %c0_6 = arith.constant 0 : index
    %5 = vector.load %arg3[%c1, %c0_5, %c0_6] : memref<9x8x8xf32, #tpu.memory_space<vmem>>, vector<1x8x8xf32>
    %6 = vector.shape_cast %5 : vector<1x8x8xf32> to vector<8x8xf32>
    %c0_7 = arith.constant 0 : index
    %c0_8 = arith.constant 0 : index
    %c1_9 = arith.constant 1 : index
    %7 = vector.load %arg1[%c0_7, %c0_8, %c1_9] : memref<1x8x693xf32, #tpu.memory_space<vmem>>, vector<1x8x640xf32>
    %8 = vector.shape_cast %7 : vector<1x8x640xf32> to vector<8x640xf32>
    %cst_10 = arith.constant dense<0.000000e+00> : vector<8x640xf32>
    %9 = tpu.matmul %6, %8, %cst_10 {dimension_numbers = #tpu.dot_dimension_numbers<[1], [0], [0], [1], [0, 0, 1, 1], [], []>} : vector<8x8xf32>, vector<8x640xf32>, vector<8x640xf32> -> vector<8x640xf32>
    %10 = arith.addf %4, %9 : vector<8x640xf32>
    %c2 = arith.constant 2 : index
    %c0_11 = arith.constant 0 : index
    %c0_12 = arith.constant 0 : index
    %11 = vector.load %arg3[%c2, %c0_11, %c0_12] : memref<9x8x8xf32, #tpu.memory_space<vmem>>, vector<1x8x8xf32>
    %12 = vector.shape_cast %11 : vector<1x8x8xf32> to vector<8x8xf32>
    %c0_13 = arith.constant 0 : index
    %c0_14 = arith.constant 0 : index
    %c2_15 = arith.constant 2 : index
    %13 = vector.load %arg1[%c0_13, %c0_14, %c2_15] : memref<1x8x693xf32, #tpu.memory_space<vmem>>, vector<1x8x640xf32>
    %14 = vector.shape_cast %13 : vector<1x8x640xf32> to vector<8x640xf32>
    %cst_16 = arith.constant dense<0.000000e+00> : vector<8x640xf32>
    %15 = tpu.matmul %12, %14, %cst_16 {dimension_numbers = #tpu.dot_dimension_numbers<[1], [0], [0], [1], [0, 0, 1, 1], [], []>} : vector<8x8xf32>, vector<8x640xf32>, vector<8x640xf32> -> vector<8x640xf32>
    %16 = arith.addf %10, %15 : vector<8x640xf32>
    %c3 = arith.constant 3 : index
    %c0_17 = arith.constant 0 : index
    %c0_18 = arith.constant 0 : index
    %17 = vector.load %arg3[%c3, %c0_17, %c0_18] : memref<9x8x8xf32, #tpu.memory_space<vmem>>, vector<1x8x8xf32>
    %18 = vector.shape_cast %17 : vector<1x8x8xf32> to vector<8x8xf32>
    %c0_19 = arith.constant 0 : index
    %c0_20 = arith.constant 0 : index
    %c21 = arith.constant 21 : index
    %19 = vector.load %arg1[%c0_19, %c0_20, %c21] : memref<1x8x693xf32, #tpu.memory_space<vmem>>, vector<1x8x640xf32>
    %20 = vector.shape_cast %19 : vector<1x8x640xf32> to vector<8x640xf32>
    %cst_21 = arith.constant dense<0.000000e+00> : vector<8x640xf32>
    %21 = tpu.matmul %18, %20, %cst_21 {dimension_numbers = #tpu.dot_dimension_numbers<[1], [0], [0], [1], [0, 0, 1, 1], [], []>} : vector<8x8xf32>, vector<8x640xf32>, vector<8x640xf32> -> vector<8x640xf32>
    %22 = arith.addf %16, %21 : vector<8x640xf32>
    %c4 = arith.constant 4 : index
    %c0_22 = arith.constant 0 : index
    %c0_23 = arith.constant 0 : index
    %23 = vector.load %arg3[%c4, %c0_22, %c0_23] : memref<9x8x8xf32, #tpu.memory_space<vmem>>, vector<1x8x8xf32>
    %24 = vector.shape_cast %23 : vector<1x8x8xf32> to vector<8x8xf32>
    %c0_24 = arith.constant 0 : index
    %c0_25 = arith.constant 0 : index
    %c22 = arith.constant 22 : index
    %25 = vector.load %arg1[%c0_24, %c0_25, %c22] : memref<1x8x693xf32, #tpu.memory_space<vmem>>, vector<1x8x640xf32>
    %26 = vector.shape_cast %25 : vector<1x8x640xf32> to vector<8x640xf32>
    %cst_26 = arith.constant dense<0.000000e+00> : vector<8x640xf32>
    %27 = tpu.matmul %24, %26, %cst_26 {dimension_numbers = #tpu.dot_dimension_numbers<[1], [0], [0], [1], [0, 0, 1, 1], [], []>} : vector<8x8xf32>, vector<8x640xf32>, vector<8x640xf32> -> vector<8x640xf32>
    %28 = arith.addf %22, %27 : vector<8x640xf32>
    %c5 = arith.constant 5 : index
    %c0_27 = arith.constant 0 : index
    %c0_28 = arith.constant 0 : index
    %29 = vector.load %arg3[%c5, %c0_27, %c0_28] : memref<9x8x8xf32, #tpu.memory_space<vmem>>, vector<1x8x8xf32>
    %30 = vector.shape_cast %29 : vector<1x8x8xf32> to vector<8x8xf32>
    %c0_29 = arith.constant 0 : index
    %c0_30 = arith.constant 0 : index
    %c23 = arith.constant 23 : index
    %31 = vector.load %arg1[%c0_29, %c0_30, %c23] : memref<1x8x693xf32, #tpu.memory_space<vmem>>, vector<1x8x640xf32>
    %32 = vector.shape_cast %31 : vector<1x8x640xf32> to vector<8x640xf32>
    %cst_31 = arith.constant dense<0.000000e+00> : vector<8x640xf32>
    %33 = tpu.matmul %30, %32, %cst_31 {dimension_numbers = #tpu.dot_dimension_numbers<[1], [0], [0], [1], [0, 0, 1, 1], [], []>} : vector<8x8xf32>, vector<8x640xf32>, vector<8x640xf32> -> vector<8x640xf32>
    %34 = arith.addf %28, %33 : vector<8x640xf32>
    %c6 = arith.constant 6 : index
    %c0_32 = arith.constant 0 : index
    %c0_33 = arith.constant 0 : index
    %35 = vector.load %arg3[%c6, %c0_32, %c0_33] : memref<9x8x8xf32, #tpu.memory_space<vmem>>, vector<1x8x8xf32>
    %36 = vector.shape_cast %35 : vector<1x8x8xf32> to vector<8x8xf32>
    %c0_34 = arith.constant 0 : index
    %c0_35 = arith.constant 0 : index
    %c42 = arith.constant 42 : index
    %37 = vector.load %arg1[%c0_34, %c0_35, %c42] : memref<1x8x693xf32, #tpu.memory_space<vmem>>, vector<1x8x640xf32>
    %38 = vector.shape_cast %37 : vector<1x8x640xf32> to vector<8x640xf32>
    %cst_36 = arith.constant dense<0.000000e+00> : vector<8x640xf32>
    %39 = tpu.matmul %36, %38, %cst_36 {dimension_numbers = #tpu.dot_dimension_numbers<[1], [0], [0], [1], [0, 0, 1, 1], [], []>} : vector<8x8xf32>, vector<8x640xf32>, vector<8x640xf32> -> vector<8x640xf32>
    %40 = arith.addf %34, %39 : vector<8x640xf32>
    %c7 = arith.constant 7 : index
    %c0_37 = arith.constant 0 : index
    %c0_38 = arith.constant 0 : index
    %41 = vector.load %arg3[%c7, %c0_37, %c0_38] : memref<9x8x8xf32, #tpu.memory_space<vmem>>, vector<1x8x8xf32>
    %42 = vector.shape_cast %41 : vector<1x8x8xf32> to vector<8x8xf32>
    %c0_39 = arith.constant 0 : index
    %c0_40 = arith.constant 0 : index
    %c43 = arith.constant 43 : index
    %43 = vector.load %arg1[%c0_39, %c0_40, %c43] : memref<1x8x693xf32, #tpu.memory_space<vmem>>, vector<1x8x640xf32>
    %44 = vector.shape_cast %43 : vector<1x8x640xf32> to vector<8x640xf32>
    %cst_41 = arith.constant dense<0.000000e+00> : vector<8x640xf32>
    %45 = tpu.matmul %42, %44, %cst_41 {dimension_numbers = #tpu.dot_dimension_numbers<[1], [0], [0], [1], [0, 0, 1, 1], [], []>} : vector<8x8xf32>, vector<8x640xf32>, vector<8x640xf32> -> vector<8x640xf32>
    %46 = arith.addf %40, %45 : vector<8x640xf32>
    %c8 = arith.constant 8 : index
    %c0_42 = arith.constant 0 : index
    %c0_43 = arith.constant 0 : index
    %47 = vector.load %arg3[%c8, %c0_42, %c0_43] : memref<9x8x8xf32, #tpu.memory_space<vmem>>, vector<1x8x8xf32>
    %48 = vector.shape_cast %47 : vector<1x8x8xf32> to vector<8x8xf32>
    %c0_44 = arith.constant 0 : index
    %c0_45 = arith.constant 0 : index
    %c44 = arith.constant 44 : index
    %49 = vector.load %arg1[%c0_44, %c0_45, %c44] : memref<1x8x693xf32, #tpu.memory_space<vmem>>, vector<1x8x640xf32>
    %50 = vector.shape_cast %49 : vector<1x8x640xf32> to vector<8x640xf32>
    %cst_46 = arith.constant dense<0.000000e+00> : vector<8x640xf32>
    %51 = tpu.matmul %48, %50, %cst_46 {dimension_numbers = #tpu.dot_dimension_numbers<[1], [0], [0], [1], [0, 0, 1, 1], [], []>} : vector<8x8xf32>, vector<8x640xf32>, vector<8x640xf32> -> vector<8x640xf32>
    %52 = arith.addf %46, %51 : vector<8x640xf32>
    %c0_47 = arith.constant 0 : index
    %c0_48 = arith.constant 0 : index
    %53 = vector.load %arg7[%c0_47, %c0_48] : memref<8x1xf32, #tpu.memory_space<vmem>>, vector<8x1xf32>
    %54 = vector.broadcast %53 : vector<8x1xf32> to vector<8x640xf32>
    %55 = arith.addf %52, %54 : vector<8x640xf32>
    %c0_49 = arith.constant 0 : index
    %c0_50 = arith.constant 0 : index
    %56 = vector.load %arg10[%c0_49, %c0_50] : memref<1x640xf32, #tpu.memory_space<vmem>>, vector<1x640xf32>
    %57 = vector.broadcast %56 : vector<1x640xf32> to vector<8x640xf32>
    %58 = arith.mulf %55, %57 : vector<8x640xf32>
    %c0_51 = arith.constant 0 : index
    %c0_52 = arith.constant 0 : index
    %59 = vector.load %arg13[%c0_51, %c0_52] : memref<8x640xf32, #tpu.memory_space<vmem>>, vector<8x640xf32>
    tpu.vector_store %arg13[%c0_51, %c0_52], %58 {strides = array<i32>} : memref<8x640xf32, #tpu.memory_space<vmem>>, vector<8x640xf32>,
    %c0_53 = arith.constant 0 : index
    %c0_54 = arith.constant 0 : index
    %c0_55 = arith.constant 0 : index
    %60 = vector.load %arg4[%c0_53, %c0_54, %c0_55] : memref<9x8x8xf32, #tpu.memory_space<vmem>>, vector<1x8x8xf32>
    %61 = vector.shape_cast %60 : vector<1x8x8xf32> to vector<8x8xf32>
    %c0_56 = arith.constant 0 : index
    %c0_57 = arith.constant 0 : index
    %62 = vector.load %arg13[%c0_56, %c0_57] : memref<8x640xf32, #tpu.memory_space<vmem>>, vector<8x512xf32>
    %cst_58 = arith.constant dense<0.000000e+00> : vector<8x512xf32>
    %63 = tpu.matmul %61, %62, %cst_58 {dimension_numbers = #tpu.dot_dimension_numbers<[1], [0], [0], [1], [0, 0, 1, 1], [], []>} : vector<8x8xf32>, vector<8x512xf32>, vector<8x512xf32> -> vector<8x512xf32>
    %c1_59 = arith.constant 1 : index
    %c0_60 = arith.constant 0 : index
    %c0_61 = arith.constant 0 : index
    %64 = vector.load %arg4[%c1_59, %c0_60, %c0_61] : memref<9x8x8xf32, #tpu.memory_space<vmem>>, vector<1x8x8xf32>
    %65 = vector.shape_cast %64 : vector<1x8x8xf32> to vector<8x8xf32>
    %c0_62 = arith.constant 0 : index
    %c1_63 = arith.constant 1 : index
    %66 = vector.load %arg13[%c0_62, %c1_63] : memref<8x640xf32, #tpu.memory_space<vmem>>, vector<8x512xf32>
    %cst_64 = arith.constant dense<0.000000e+00> : vector<8x512xf32>
    %67 = tpu.matmul %65, %66, %cst_64 {dimension_numbers = #tpu.dot_dimension_numbers<[1], [0], [0], [1], [0, 0, 1, 1], [], []>} : vector<8x8xf32>, vector<8x512xf32>, vector<8x512xf32> -> vector<8x512xf32>
    %68 = arith.addf %63, %67 : vector<8x512xf32>
    %c2_65 = arith.constant 2 : index
    %c0_66 = arith.constant 0 : index
    %c0_67 = arith.constant 0 : index
    %69 = vector.load %arg4[%c2_65, %c0_66, %c0_67] : memref<9x8x8xf32, #tpu.memory_space<vmem>>, vector<1x8x8xf32>
    %70 = vector.shape_cast %69 : vector<1x8x8xf32> to vector<8x8xf32>
    %c0_68 = arith.constant 0 : index
    %c2_69 = arith.constant 2 : index
    %71 = vector.load %arg13[%c0_68, %c2_69] : memref<8x640xf32, #tpu.memory_space<vmem>>, vector<8x512xf32>
    %cst_70 = arith.constant dense<0.000000e+00> : vector<8x512xf32>
    %72 = tpu.matmul %70, %71, %cst_70 {dimension_numbers = #tpu.dot_dimension_numbers<[1], [0], [0], [1], [0, 0, 1, 1], [], []>} : vector<8x8xf32>, vector<8x512xf32>, vector<8x512xf32> -> vector<8x512xf32>
    %73 = arith.addf %68, %72 : vector<8x512xf32>
    %c3_71 = arith.constant 3 : index
    %c0_72 = arith.constant 0 : index
    %c0_73 = arith.constant 0 : index
    %74 = vector.load %arg4[%c3_71, %c0_72, %c0_73] : memref<9x8x8xf32, #tpu.memory_space<vmem>>, vector<1x8x8xf32>
    %75 = vector.shape_cast %74 : vector<1x8x8xf32> to vector<8x8xf32>
    %c0_74 = arith.constant 0 : index
    %c21_75 = arith.constant 21 : index
    %76 = vector.load %arg13[%c0_74, %c21_75] : memref<8x640xf32, #tpu.memory_space<vmem>>, vector<8x512xf32>
    %cst_76 = arith.constant dense<0.000000e+00> : vector<8x512xf32>
    %77 = tpu.matmul %75, %76, %cst_76 {dimension_numbers = #tpu.dot_dimension_numbers<[1], [0], [0], [1], [0, 0, 1, 1], [], []>} : vector<8x8xf32>, vector<8x512xf32>, vector<8x512xf32> -> vector<8x512xf32>
    %78 = arith.addf %73, %77 : vector<8x512xf32>
    %c4_77 = arith.constant 4 : index
    %c0_78 = arith.constant 0 : index
    %c0_79 = arith.constant 0 : index
    %79 = vector.load %arg4[%c4_77, %c0_78, %c0_79] : memref<9x8x8xf32, #tpu.memory_space<vmem>>, vector<1x8x8xf32>
    %80 = vector.shape_cast %79 : vector<1x8x8xf32> to vector<8x8xf32>
    %c0_80 = arith.constant 0 : index
    %c22_81 = arith.constant 22 : index
    %81 = vector.load %arg13[%c0_80, %c22_81] : memref<8x640xf32, #tpu.memory_space<vmem>>, vector<8x512xf32>
    %cst_82 = arith.constant dense<0.000000e+00> : vector<8x512xf32>
    %82 = tpu.matmul %80, %81, %cst_82 {dimension_numbers = #tpu.dot_dimension_numbers<[1], [0], [0], [1], [0, 0, 1, 1], [], []>} : vector<8x8xf32>, vector<8x512xf32>, vector<8x512xf32> -> vector<8x512xf32>
    %83 = arith.addf %78, %82 : vector<8x512xf32>
    %c5_83 = arith.constant 5 : index
    %c0_84 = arith.constant 0 : index
    %c0_85 = arith.constant 0 : index
    %84 = vector.load %arg4[%c5_83, %c0_84, %c0_85] : memref<9x8x8xf32, #tpu.memory_space<vmem>>, vector<1x8x8xf32>
    %85 = vector.shape_cast %84 : vector<1x8x8xf32> to vector<8x8xf32>
    %c0_86 = arith.constant 0 : index
    %c23_87 = arith.constant 23 : index
    %86 = vector.load %arg13[%c0_86, %c23_87] : memref<8x640xf32, #tpu.memory_space<vmem>>, vector<8x512xf32>
    %cst_88 = arith.constant dense<0.000000e+00> : vector<8x512xf32>
    %87 = tpu.matmul %85, %86, %cst_88 {dimension_numbers = #tpu.dot_dimension_numbers<[1], [0], [0], [1], [0, 0, 1, 1], [], []>} : vector<8x8xf32>, vector<8x512xf32>, vector<8x512xf32> -> vector<8x512xf32>
    %88 = arith.addf %83, %87 : vector<8x512xf32>
    %c6_89 = arith.constant 6 : index
    %c0_90 = arith.constant 0 : index
    %c0_91 = arith.constant 0 : index
    %89 = vector.load %arg4[%c6_89, %c0_90, %c0_91] : memref<9x8x8xf32, #tpu.memory_space<vmem>>, vector<1x8x8xf32>
    %90 = vector.shape_cast %89 : vector<1x8x8xf32> to vector<8x8xf32>
    %c0_92 = arith.constant 0 : index
    %c42_93 = arith.constant 42 : index
    %91 = vector.load %arg13[%c0_92, %c42_93] : memref<8x640xf32, #tpu.memory_space<vmem>>, vector<8x512xf32>
    %cst_94 = arith.constant dense<0.000000e+00> : vector<8x512xf32>
    %92 = tpu.matmul %90, %91, %cst_94 {dimension_numbers = #tpu.dot_dimension_numbers<[1], [0], [0], [1], [0, 0, 1, 1], [], []>} : vector<8x8xf32>, vector<8x512xf32>, vector<8x512xf32> -> vector<8x512xf32>
    %93 = arith.addf %88, %92 : vector<8x512xf32>
    %c7_95 = arith.constant 7 : index
    %c0_96 = arith.constant 0 : index
    %c0_97 = arith.constant 0 : index
    %94 = vector.load %arg4[%c7_95, %c0_96, %c0_97] : memref<9x8x8xf32, #tpu.memory_space<vmem>>, vector<1x8x8xf32>
    %95 = vector.shape_cast %94 : vector<1x8x8xf32> to vector<8x8xf32>
    %c0_98 = arith.constant 0 : index
    %c43_99 = arith.constant 43 : index
    %96 = vector.load %arg13[%c0_98, %c43_99] : memref<8x640xf32, #tpu.memory_space<vmem>>, vector<8x512xf32>
    %cst_100 = arith.constant dense<0.000000e+00> : vector<8x512xf32>
    %97 = tpu.matmul %95, %96, %cst_100 {dimension_numbers = #tpu.dot_dimension_numbers<[1], [0], [0], [1], [0, 0, 1, 1], [], []>} : vector<8x8xf32>, vector<8x512xf32>, vector<8x512xf32> -> vector<8x512xf32>
    %98 = arith.addf %93, %97 : vector<8x512xf32>
    %c8_101 = arith.constant 8 : index
    %c0_102 = arith.constant 0 : index
    %c0_103 = arith.constant 0 : index
    %99 = vector.load %arg4[%c8_101, %c0_102, %c0_103] : memref<9x8x8xf32, #tpu.memory_space<vmem>>, vector<1x8x8xf32>
    %100 = vector.shape_cast %99 : vector<1x8x8xf32> to vector<8x8xf32>
    %c0_104 = arith.constant 0 : index
    %c44_105 = arith.constant 44 : index
    %101 = vector.load %arg13[%c0_104, %c44_105] : memref<8x640xf32, #tpu.memory_space<vmem>>, vector<8x512xf32>
    %cst_106 = arith.constant dense<0.000000e+00> : vector<8x512xf32>
    %102 = tpu.matmul %100, %101, %cst_106 {dimension_numbers = #tpu.dot_dimension_numbers<[1], [0], [0], [1], [0, 0, 1, 1], [], []>} : vector<8x8xf32>, vector<8x512xf32>, vector<8x512xf32> -> vector<8x512xf32>
    %103 = arith.addf %98, %102 : vector<8x512xf32>
    %c0_107 = arith.constant 0 : index
    %c0_108 = arith.constant 0 : index
    %c0_109 = arith.constant 0 : index
    %104 = vector.load %arg5[%c0_107, %c0_108, %c0_109] : memref<9x8x8xf32, #tpu.memory_space<vmem>>, vector<1x8x8xf32>
    %105 = vector.shape_cast %104 : vector<1x8x8xf32> to vector<8x8xf32>
    %c0_110 = arith.constant 0 : index
    %c0_111 = arith.constant 0 : index
    %c0_112 = arith.constant 0 : index
    %106 = vector.load %arg2[%c0_110, %c0_111, %c0_112] : memref<1x8x567xf32, #tpu.memory_space<vmem>>, vector<1x8x512xf32>
    %107 = vector.shape_cast %106 : vector<1x8x512xf32> to vector<8x512xf32>
    %cst_113 = arith.constant dense<0.000000e+00> : vector<8x512xf32>
    %108 = tpu.matmul %105, %107, %cst_113 {dimension_numbers = #tpu.dot_dimension_numbers<[1], [0], [0], [1], [0, 0, 1, 1], [], []>} : vector<8x8xf32>, vector<8x512xf32>, vector<8x512xf32> -> vector<8x512xf32>
    %109 = arith.addf %103, %108 : vector<8x512xf32>
    %c1_114 = arith.constant 1 : index
    %c0_115 = arith.constant 0 : index
    %c0_116 = arith.constant 0 : index
    %110 = vector.load %arg5[%c1_114, %c0_115, %c0_116] : memref<9x8x8xf32, #tpu.memory_space<vmem>>, vector<1x8x8xf32>
    %111 = vector.shape_cast %110 : vector<1x8x8xf32> to vector<8x8xf32>
    %c0_117 = arith.constant 0 : index
    %c0_118 = arith.constant 0 : index
    %c1_119 = arith.constant 1 : index
    %112 = vector.load %arg2[%c0_117, %c0_118, %c1_119] : memref<1x8x567xf32, #tpu.memory_space<vmem>>, vector<1x8x512xf32>
    %113 = vector.shape_cast %112 : vector<1x8x512xf32> to vector<8x512xf32>
    %cst_120 = arith.constant dense<0.000000e+00> : vector<8x512xf32>
    %114 = tpu.matmul %111, %113, %cst_120 {dimension_numbers = #tpu.dot_dimension_numbers<[1], [0], [0], [1], [0, 0, 1, 1], [], []>} : vector<8x8xf32>, vector<8x512xf32>, vector<8x512xf32> -> vector<8x512xf32>
    %115 = arith.addf %109, %114 : vector<8x512xf32>
    %c2_121 = arith.constant 2 : index
    %c0_122 = arith.constant 0 : index
    %c0_123 = arith.constant 0 : index
    %116 = vector.load %arg5[%c2_121, %c0_122, %c0_123] : memref<9x8x8xf32, #tpu.memory_space<vmem>>, vector<1x8x8xf32>
    %117 = vector.shape_cast %116 : vector<1x8x8xf32> to vector<8x8xf32>
    %c0_124 = arith.constant 0 : index
    %c0_125 = arith.constant 0 : index
    %c2_126 = arith.constant 2 : index
    %118 = vector.load %arg2[%c0_124, %c0_125, %c2_126] : memref<1x8x567xf32, #tpu.memory_space<vmem>>, vector<1x8x512xf32>
    %119 = vector.shape_cast %118 : vector<1x8x512xf32> to vector<8x512xf32>
    %cst_127 = arith.constant dense<0.000000e+00> : vector<8x512xf32>
    %120 = tpu.matmul %117, %119, %cst_127 {dimension_numbers = #tpu.dot_dimension_numbers<[1], [0], [0], [1], [0, 0, 1, 1], [], []>} : vector<8x8xf32>, vector<8x512xf32>, vector<8x512xf32> -> vector<8x512xf32>
    %121 = arith.addf %115, %120 : vector<8x512xf32>
    %c3_128 = arith.constant 3 : index
    %c0_129 = arith.constant 0 : index
    %c0_130 = arith.constant 0 : index
    %122 = vector.load %arg5[%c3_128, %c0_129, %c0_130] : memref<9x8x8xf32, #tpu.memory_space<vmem>>, vector<1x8x8xf32>
    %123 = vector.shape_cast %122 : vector<1x8x8xf32> to vector<8x8xf32>
    %c0_131 = arith.constant 0 : index
    %c0_132 = arith.constant 0 : index
    %c21_133 = arith.constant 21 : index
    %124 = vector.load %arg2[%c0_131, %c0_132, %c21_133] : memref<1x8x567xf32, #tpu.memory_space<vmem>>, vector<1x8x512xf32>
    %125 = vector.shape_cast %124 : vector<1x8x512xf32> to vector<8x512xf32>
    %cst_134 = arith.constant dense<0.000000e+00> : vector<8x512xf32>
    %126 = tpu.matmul %123, %125, %cst_134 {dimension_numbers = #tpu.dot_dimension_numbers<[1], [0], [0], [1], [0, 0, 1, 1], [], []>} : vector<8x8xf32>, vector<8x512xf32>, vector<8x512xf32> -> vector<8x512xf32>
    %127 = arith.addf %121, %126 : vector<8x512xf32>
    %c4_135 = arith.constant 4 : index
    %c0_136 = arith.constant 0 : index
    %c0_137 = arith.constant 0 : index
    %128 = vector.load %arg5[%c4_135, %c0_136, %c0_137] : memref<9x8x8xf32, #tpu.memory_space<vmem>>, vector<1x8x8xf32>
    %129 = vector.shape_cast %128 : vector<1x8x8xf32> to vector<8x8xf32>
    %c0_138 = arith.constant 0 : index
    %c0_139 = arith.constant 0 : index
    %c22_140 = arith.constant 22 : index
    %130 = vector.load %arg2[%c0_138, %c0_139, %c22_140] : memref<1x8x567xf32, #tpu.memory_space<vmem>>, vector<1x8x512xf32>
    %131 = vector.shape_cast %130 : vector<1x8x512xf32> to vector<8x512xf32>
    %cst_141 = arith.constant dense<0.000000e+00> : vector<8x512xf32>
    %132 = tpu.matmul %129, %131, %cst_141 {dimension_numbers = #tpu.dot_dimension_numbers<[1], [0], [0], [1], [0, 0, 1, 1], [], []>} : vector<8x8xf32>, vector<8x512xf32>, vector<8x512xf32> -> vector<8x512xf32>
    %133 = arith.addf %127, %132 : vector<8x512xf32>
    %c5_142 = arith.constant 5 : index
    %c0_143 = arith.constant 0 : index
    %c0_144 = arith.constant 0 : index
    %134 = vector.load %arg5[%c5_142, %c0_143, %c0_144] : memref<9x8x8xf32, #tpu.memory_space<vmem>>, vector<1x8x8xf32>
    %135 = vector.shape_cast %134 : vector<1x8x8xf32> to vector<8x8xf32>
    %c0_145 = arith.constant 0 : index
    %c0_146 = arith.constant 0 : index
    %c23_147 = arith.constant 23 : index
    %136 = vector.load %arg2[%c0_145, %c0_146, %c23_147] : memref<1x8x567xf32, #tpu.memory_space<vmem>>, vector<1x8x512xf32>
    %137 = vector.shape_cast %136 : vector<1x8x512xf32> to vector<8x512xf32>
    %cst_148 = arith.constant dense<0.000000e+00> : vector<8x512xf32>
    %138 = tpu.matmul %135, %137, %cst_148 {dimension_numbers = #tpu.dot_dimension_numbers<[1], [0], [0], [1], [0, 0, 1, 1], [], []>} : vector<8x8xf32>, vector<8x512xf32>, vector<8x512xf32> -> vector<8x512xf32>
    %139 = arith.addf %133, %138 : vector<8x512xf32>
    %c6_149 = arith.constant 6 : index
    %c0_150 = arith.constant 0 : index
    %c0_151 = arith.constant 0 : index
    %140 = vector.load %arg5[%c6_149, %c0_150, %c0_151] : memref<9x8x8xf32, #tpu.memory_space<vmem>>, vector<1x8x8xf32>
    %141 = vector.shape_cast %140 : vector<1x8x8xf32> to vector<8x8xf32>
    %c0_152 = arith.constant 0 : index
    %c0_153 = arith.constant 0 : index
    %c42_154 = arith.constant 42 : index
    %142 = vector.load %arg2[%c0_152, %c0_153, %c42_154] : memref<1x8x567xf32, #tpu.memory_space<vmem>>, vector<1x8x512xf32>
    %143 = vector.shape_cast %142 : vector<1x8x512xf32> to vector<8x512xf32>
    %cst_155 = arith.constant dense<0.000000e+00> : vector<8x512xf32>
    %144 = tpu.matmul %141, %143, %cst_155 {dimension_numbers = #tpu.dot_dimension_numbers<[1], [0], [0], [1], [0, 0, 1, 1], [], []>} : vector<8x8xf32>, vector<8x512xf32>, vector<8x512xf32> -> vector<8x512xf32>
    %145 = arith.addf %139, %144 : vector<8x512xf32>
    %c7_156 = arith.constant 7 : index
    %c0_157 = arith.constant 0 : index
    %c0_158 = arith.constant 0 : index
    %146 = vector.load %arg5[%c7_156, %c0_157, %c0_158] : memref<9x8x8xf32, #tpu.memory_space<vmem>>, vector<1x8x8xf32>
    %147 = vector.shape_cast %146 : vector<1x8x8xf32> to vector<8x8xf32>
    %c0_159 = arith.constant 0 : index
    %c0_160 = arith.constant 0 : index
    %c43_161 = arith.constant 43 : index
    %148 = vector.load %arg2[%c0_159, %c0_160, %c43_161] : memref<1x8x567xf32, #tpu.memory_space<vmem>>, vector<1x8x512xf32>
    %149 = vector.shape_cast %148 : vector<1x8x512xf32> to vector<8x512xf32>
    %cst_162 = arith.constant dense<0.000000e+00> : vector<8x512xf32>
    %150 = tpu.matmul %147, %149, %cst_162 {dimension_numbers = #tpu.dot_dimension_numbers<[1], [0], [0], [1], [0, 0, 1, 1], [], []>} : vector<8x8xf32>, vector<8x512xf32>, vector<8x512xf32> -> vector<8x512xf32>
    %151 = arith.addf %145, %150 : vector<8x512xf32>
    %c8_163 = arith.constant 8 : index
    %c0_164 = arith.constant 0 : index
    %c0_165 = arith.constant 0 : index
    %152 = vector.load %arg5[%c8_163, %c0_164, %c0_165] : memref<9x8x8xf32, #tpu.memory_space<vmem>>, vector<1x8x8xf32>
    %153 = vector.shape_cast %152 : vector<1x8x8xf32> to vector<8x8xf32>
    %c0_166 = arith.constant 0 : index
    %c0_167 = arith.constant 0 : index
    %c44_168 = arith.constant 44 : index
    %154 = vector.load %arg2[%c0_166, %c0_167, %c44_168] : memref<1x8x567xf32, #tpu.memory_space<vmem>>, vector<1x8x512xf32>
    %155 = vector.shape_cast %154 : vector<1x8x512xf32> to vector<8x512xf32>
    %cst_169 = arith.constant dense<0.000000e+00> : vector<8x512xf32>
    %156 = tpu.matmul %153, %155, %cst_169 {dimension_numbers = #tpu.dot_dimension_numbers<[1], [0], [0], [1], [0, 0, 1, 1], [], []>} : vector<8x8xf32>, vector<8x512xf32>, vector<8x512xf32> -> vector<8x512xf32>
    %157 = arith.addf %151, %156 : vector<8x512xf32>
    %c0_170 = arith.constant 0 : index
    %c0_171 = arith.constant 0 : index
    %158 = vector.load %arg8[%c0_170, %c0_171] : memref<8x1xf32, #tpu.memory_space<vmem>>, vector<8x1xf32>
    %159 = vector.broadcast %158 : vector<8x1xf32> to vector<8x512xf32>
    %160 = arith.addf %157, %159 : vector<8x512xf32>
    %161 = math.tanh %160 : vector<8x512xf32>
    %c0_172 = arith.constant 0 : index
    %c0_173 = arith.constant 0 : index
    %162 = vector.load %arg11[%c0_172, %c0_173] : memref<1x512xf32, #tpu.memory_space<vmem>>, vector<1x512xf32>
    %163 = vector.broadcast %162 : vector<1x512xf32> to vector<8x512xf32>
    %164 = arith.mulf %161, %163 : vector<8x512xf32>
    %c0_174 = arith.constant 0 : index
    %c0_175 = arith.constant 0 : index
    %165 = vector.load %arg14[%c0_174, %c0_175] : memref<8x512xf32, #tpu.memory_space<vmem>>, vector<8x512xf32>
    tpu.vector_store %arg14[%c0_174, %c0_175], %164 {strides = array<i32>} : memref<8x512xf32, #tpu.memory_space<vmem>>, vector<8x512xf32>,
    %c0_176 = arith.constant 0 : index
    %c0_177 = arith.constant 0 : index
    %c0_178 = arith.constant 0 : index
    %166 = vector.load %arg6[%c0_176, %c0_177, %c0_178] : memref<9x8x8xf32, #tpu.memory_space<vmem>>, vector<1x8x8xf32>
    %167 = vector.shape_cast %166 : vector<1x8x8xf32> to vector<8x8xf32>
    %c0_179 = arith.constant 0 : index
    %c0_180 = arith.constant 0 : index
    %168 = vector.load %arg14[%c0_179, %c0_180] : memref<8x512xf32, #tpu.memory_space<vmem>>, vector<8x384xf32>
    %cst_181 = arith.constant dense<0.000000e+00> : vector<8x384xf32>
    %169 = tpu.matmul %167, %168, %cst_181 {dimension_numbers = #tpu.dot_dimension_numbers<[1], [0], [0], [1], [0, 0, 1, 1], [], []>} : vector<8x8xf32>, vector<8x384xf32>, vector<8x384xf32> -> vector<8x384xf32>
    %c1_182 = arith.constant 1 : index
    %c0_183 = arith.constant 0 : index
    %c0_184 = arith.constant 0 : index
    %170 = vector.load %arg6[%c1_182, %c0_183, %c0_184] : memref<9x8x8xf32, #tpu.memory_space<vmem>>, vector<1x8x8xf32>
    %171 = vector.shape_cast %170 : vector<1x8x8xf32> to vector<8x8xf32>
    %c0_185 = arith.constant 0 : index
    %c1_186 = arith.constant 1 : index
    %172 = vector.load %arg14[%c0_185, %c1_186] : memref<8x512xf32, #tpu.memory_space<vmem>>, vector<8x384xf32>
    %cst_187 = arith.constant dense<0.000000e+00> : vector<8x384xf32>
    %173 = tpu.matmul %171, %172, %cst_187 {dimension_numbers = #tpu.dot_dimension_numbers<[1], [0], [0], [1], [0, 0, 1, 1], [], []>} : vector<8x8xf32>, vector<8x384xf32>, vector<8x384xf32> -> vector<8x384xf32>
    %174 = arith.addf %169, %173 : vector<8x384xf32>
    %c2_188 = arith.constant 2 : index
    %c0_189 = arith.constant 0 : index
    %c0_190 = arith.constant 0 : index
    %175 = vector.load %arg6[%c2_188, %c0_189, %c0_190] : memref<9x8x8xf32, #tpu.memory_space<vmem>>, vector<1x8x8xf32>
    %176 = vector.shape_cast %175 : vector<1x8x8xf32> to vector<8x8xf32>
    %c0_191 = arith.constant 0 : index
    %c2_192 = arith.constant 2 : index
    %177 = vector.load %arg14[%c0_191, %c2_192] : memref<8x512xf32, #tpu.memory_space<vmem>>, vector<8x384xf32>
    %cst_193 = arith.constant dense<0.000000e+00> : vector<8x384xf32>
    %178 = tpu.matmul %176, %177, %cst_193 {dimension_numbers = #tpu.dot_dimension_numbers<[1], [0], [0], [1], [0, 0, 1, 1], [], []>} : vector<8x8xf32>, vector<8x384xf32>, vector<8x384xf32> -> vector<8x384xf32>
    %179 = arith.addf %174, %178 : vector<8x384xf32>
    %c3_194 = arith.constant 3 : index
    %c0_195 = arith.constant 0 : index
    %c0_196 = arith.constant 0 : index
    %180 = vector.load %arg6[%c3_194, %c0_195, %c0_196] : memref<9x8x8xf32, #tpu.memory_space<vmem>>, vector<1x8x8xf32>
    %181 = vector.shape_cast %180 : vector<1x8x8xf32> to vector<8x8xf32>
    %c0_197 = arith.constant 0 : index
    %c21_198 = arith.constant 21 : index
    %182 = vector.load %arg14[%c0_197, %c21_198] : memref<8x512xf32, #tpu.memory_space<vmem>>, vector<8x384xf32>
    %cst_199 = arith.constant dense<0.000000e+00> : vector<8x384xf32>
    %183 = tpu.matmul %181, %182, %cst_199 {dimension_numbers = #tpu.dot_dimension_numbers<[1], [0], [0], [1], [0, 0, 1, 1], [], []>} : vector<8x8xf32>, vector<8x384xf32>, vector<8x384xf32> -> vector<8x384xf32>
    %184 = arith.addf %179, %183 : vector<8x384xf32>
    %c4_200 = arith.constant 4 : index
    %c0_201 = arith.constant 0 : index
    %c0_202 = arith.constant 0 : index
    %185 = vector.load %arg6[%c4_200, %c0_201, %c0_202] : memref<9x8x8xf32, #tpu.memory_space<vmem>>, vector<1x8x8xf32>
    %186 = vector.shape_cast %185 : vector<1x8x8xf32> to vector<8x8xf32>
    %c0_203 = arith.constant 0 : index
    %c22_204 = arith.constant 22 : index
    %187 = vector.load %arg14[%c0_203, %c22_204] : memref<8x512xf32, #tpu.memory_space<vmem>>, vector<8x384xf32>
    %cst_205 = arith.constant dense<0.000000e+00> : vector<8x384xf32>
    %188 = tpu.matmul %186, %187, %cst_205 {dimension_numbers = #tpu.dot_dimension_numbers<[1], [0], [0], [1], [0, 0, 1, 1], [], []>} : vector<8x8xf32>, vector<8x384xf32>, vector<8x384xf32> -> vector<8x384xf32>
    %189 = arith.addf %184, %188 : vector<8x384xf32>
    %c5_206 = arith.constant 5 : index
    %c0_207 = arith.constant 0 : index
    %c0_208 = arith.constant 0 : index
    %190 = vector.load %arg6[%c5_206, %c0_207, %c0_208] : memref<9x8x8xf32, #tpu.memory_space<vmem>>, vector<1x8x8xf32>
    %191 = vector.shape_cast %190 : vector<1x8x8xf32> to vector<8x8xf32>
    %c0_209 = arith.constant 0 : index
    %c23_210 = arith.constant 23 : index
    %192 = vector.load %arg14[%c0_209, %c23_210] : memref<8x512xf32, #tpu.memory_space<vmem>>, vector<8x384xf32>
    %cst_211 = arith.constant dense<0.000000e+00> : vector<8x384xf32>
    %193 = tpu.matmul %191, %192, %cst_211 {dimension_numbers = #tpu.dot_dimension_numbers<[1], [0], [0], [1], [0, 0, 1, 1], [], []>} : vector<8x8xf32>, vector<8x384xf32>, vector<8x384xf32> -> vector<8x384xf32>
    %194 = arith.addf %189, %193 : vector<8x384xf32>
    %c6_212 = arith.constant 6 : index
    %c0_213 = arith.constant 0 : index
    %c0_214 = arith.constant 0 : index
    %195 = vector.load %arg6[%c6_212, %c0_213, %c0_214] : memref<9x8x8xf32, #tpu.memory_space<vmem>>, vector<1x8x8xf32>
    %196 = vector.shape_cast %195 : vector<1x8x8xf32> to vector<8x8xf32>
    %c0_215 = arith.constant 0 : index
    %c42_216 = arith.constant 42 : index
    %197 = vector.load %arg14[%c0_215, %c42_216] : memref<8x512xf32, #tpu.memory_space<vmem>>, vector<8x384xf32>
    %cst_217 = arith.constant dense<0.000000e+00> : vector<8x384xf32>
    %198 = tpu.matmul %196, %197, %cst_217 {dimension_numbers = #tpu.dot_dimension_numbers<[1], [0], [0], [1], [0, 0, 1, 1], [], []>} : vector<8x8xf32>, vector<8x384xf32>, vector<8x384xf32> -> vector<8x384xf32>
    %199 = arith.addf %194, %198 : vector<8x384xf32>
    %c7_218 = arith.constant 7 : index
    %c0_219 = arith.constant 0 : index
    %c0_220 = arith.constant 0 : index
    %200 = vector.load %arg6[%c7_218, %c0_219, %c0_220] : memref<9x8x8xf32, #tpu.memory_space<vmem>>, vector<1x8x8xf32>
    %201 = vector.shape_cast %200 : vector<1x8x8xf32> to vector<8x8xf32>
    %c0_221 = arith.constant 0 : index
    %c43_222 = arith.constant 43 : index
    %202 = vector.load %arg14[%c0_221, %c43_222] : memref<8x512xf32, #tpu.memory_space<vmem>>, vector<8x384xf32>
    %cst_223 = arith.constant dense<0.000000e+00> : vector<8x384xf32>
    %203 = tpu.matmul %201, %202, %cst_223 {dimension_numbers = #tpu.dot_dimension_numbers<[1], [0], [0], [1], [0, 0, 1, 1], [], []>} : vector<8x8xf32>, vector<8x384xf32>, vector<8x384xf32> -> vector<8x384xf32>
    %204 = arith.addf %199, %203 : vector<8x384xf32>
    %c8_224 = arith.constant 8 : index
    %c0_225 = arith.constant 0 : index
    %c0_226 = arith.constant 0 : index
    %205 = vector.load %arg6[%c8_224, %c0_225, %c0_226] : memref<9x8x8xf32, #tpu.memory_space<vmem>>, vector<1x8x8xf32>
    %206 = vector.shape_cast %205 : vector<1x8x8xf32> to vector<8x8xf32>
    %c0_227 = arith.constant 0 : index
    %c44_228 = arith.constant 44 : index
    %207 = vector.load %arg14[%c0_227, %c44_228] : memref<8x512xf32, #tpu.memory_space<vmem>>, vector<8x384xf32>
    %cst_229 = arith.constant dense<0.000000e+00> : vector<8x384xf32>
    %208 = tpu.matmul %206, %207, %cst_229 {dimension_numbers = #tpu.dot_dimension_numbers<[1], [0], [0], [1], [0, 0, 1, 1], [], []>} : vector<8x8xf32>, vector<8x384xf32>, vector<8x384xf32> -> vector<8x384xf32>
    %209 = arith.addf %204, %208 : vector<8x384xf32>
    %c0_230 = arith.constant 0 : index
    %c0_231 = arith.constant 0 : index
    %210 = vector.load %arg9[%c0_230, %c0_231] : memref<8x1xf32, #tpu.memory_space<vmem>>, vector<8x1xf32>
    %211 = vector.broadcast %210 : vector<8x1xf32> to vector<8x384xf32>
    %212 = arith.addf %209, %211 : vector<8x384xf32>
    %213 = math.tanh %212 : vector<8x384xf32>
    %c0_232 = arith.constant 0 : index
    %c0_233 = arith.constant 0 : index
    %c0_234 = arith.constant 0 : index
    %214 = vector.load %arg12[%c0_232, %c0_233, %c0_234] : memref<1x8x384xf32, #tpu.memory_space<vmem>>, vector<1x8x384xf32>
    %215 = vector.shape_cast %214 : vector<1x8x384xf32> to vector<8x384xf32>
    %216 = vector.shape_cast %213 : vector<8x384xf32> to vector<1x8x384xf32>
    tpu.vector_store %arg12[%c0_232, %c0_233, %c0_234], %216 {strides = array<i32>} : memref<1x8x384xf32, #tpu.memory_space<vmem>>, vector<1x8x384xf32>,
    return
  }
  func.func @transform_0(%arg0: i32) -> (i32, i32, i32) {
    %c0_i32 = arith.constant 0 : i32
    %c0_i32_0 = arith.constant 0 : i32
    %c0_i32_1 = arith.constant 0 : i32
    return %arg0, %c0_i32, %c0_i32_0 : i32, i32, i32
  }
  func.func @transform_1(%arg0: i32) -> (i32, i32, i32) {
    %c0_i32 = arith.constant 0 : i32
    %c0_i32_0 = arith.constant 0 : i32
    %c0_i32_1 = arith.constant 0 : i32
    return %arg0, %c0_i32, %c0_i32_0 : i32, i32, i32
  }
  func.func @transform_2(%arg0: i32) -> (i32, i32, i32) {
    %c0_i32 = arith.constant 0 : i32
    %c0_i32_0 = arith.constant 0 : i32
    %c0_i32_1 = arith.constant 0 : i32
    %c0_i32_2 = arith.constant 0 : i32
    return %c0_i32, %c0_i32_0, %c0_i32_1 : i32, i32, i32
  }
  func.func @transform_3(%arg0: i32) -> (i32, i32, i32) {
    %c0_i32 = arith.constant 0 : i32
    %c0_i32_0 = arith.constant 0 : i32
    %c0_i32_1 = arith.constant 0 : i32
    %c0_i32_2 = arith.constant 0 : i32
    return %c0_i32, %c0_i32_0, %c0_i32_1 : i32, i32, i32
  }
  func.func @transform_4(%arg0: i32) -> (i32, i32, i32) {
    %c0_i32 = arith.constant 0 : i32
    %c0_i32_0 = arith.constant 0 : i32
    %c0_i32_1 = arith.constant 0 : i32
    %c0_i32_2 = arith.constant 0 : i32
    return %c0_i32, %c0_i32_0, %c0_i32_1 : i32, i32, i32
  }
  func.func @transform_5(%arg0: i32) -> (i32, i32, i32) {
    %c0_i32 = arith.constant 0 : i32
    %c0_i32_0 = arith.constant 0 : i32
    %c0_i32_1 = arith.constant 0 : i32
    %c0_i32_2 = arith.constant 0 : i32
    return %c0_i32, %c0_i32_0, %c0_i32_1 : i32, i32, i32
  }
  func.func @transform_6(%arg0: i32) -> (i32, i32) {
    %c0_i32 = arith.constant 0 : i32
    %c0_i32_0 = arith.constant 0 : i32
    %c0_i32_1 = arith.constant 0 : i32
    return %c0_i32, %c0_i32_0 : i32, i32
  }
  func.func @transform_7(%arg0: i32) -> (i32, i32) {
    %c0_i32 = arith.constant 0 : i32
    %c0_i32_0 = arith.constant 0 : i32
    %c0_i32_1 = arith.constant 0 : i32
    return %c0_i32, %c0_i32_0 : i32, i32
  }
  func.func @transform_8(%arg0: i32) -> (i32, i32) {
    %c0_i32 = arith.constant 0 : i32
    %c0_i32_0 = arith.constant 0 : i32
    %c0_i32_1 = arith.constant 0 : i32
    return %c0_i32, %c0_i32_0 : i32, i32
  }
  func.func @transform_9(%arg0: i32) -> (i32, i32) {
    %c0_i32 = arith.constant 0 : i32
    %c0_i32_0 = arith.constant 0 : i32
    %c0_i32_1 = arith.constant 0 : i32
    return %c0_i32, %c0_i32_0 : i32, i32
  }
  func.func @transform_10(%arg0: i32) -> (i32, i32) {
    %c0_i32 = arith.constant 0 : i32
    %c0_i32_0 = arith.constant 0 : i32
    %c0_i32_1 = arith.constant 0 : i32
    return %c0_i32, %c0_i32_0 : i32, i32
  }
  func.func @transform_11(%arg0: i32) -> (i32, i32, i32) {
    %c0_i32 = arith.constant 0 : i32
    %c0_i32_0 = arith.constant 0 : i32
    %c0_i32_1 = arith.constant 0 : i32
    return %arg0, %c0_i32, %c0_i32_0 : i32, i32, i32
  }
}

</mosaic_0001>

<bundles_post_ra>
// kernel: tpu_custom_call.1
= control target key start
LH: loop header
LB: loop body
LE: loop exit
PB: predicated region body
PF: predicated region fallthrough
CT: control target
= control target key end

     0   :  { %s8918_s0 = inlined_call_operand.vmem [shape: f32[2,8,693], index: 0, kind: input, shape index: {}]   ;;  %s8919_s1 = inlined_call_operand.vmem [shape: f32[2,8,567], index: 1, kind: input, shape index: {}]   ;;  %s8920_s2 = inlined_call_operand.vmem [shape: f32[9,8,8], index: 2, kind: input, shape index: {}]   ;;  %s8921_s3 = inlined_call_operand.vmem [shape: f32[9,8,8], index: 3, kind: input, shape index: {}]   ;;  %s8922_s4 = inlined_call_operand.vmem [shape: f32[9,8,8], index: 4, kind: input, shape index: {}]   ;;  %s8923_s5 = inlined_call_operand.vmem [shape: f32[9,8,8], index: 5, kind: input, shape index: {}]   ;;  %s8924_s6 = inlined_call_operand.vmem [shape: f32[8,1], index: 6, kind: input, shape index: {}]   ;;  %s8925_s7 = inlined_call_operand.vmem [shape: f32[8,1], index: 7, kind: input, shape index: {}]   ;;  %s8926_s8 = inlined_call_operand.vmem [shape: f32[8,1], index: 8, kind: input, shape index: {}]   ;;  %s8927_s9 = inlined_call_operand.vmem [shape: f32[1,640], index: 9, kind: input, shape index: {}]   ;;  %s8928_s10 = inlined_call_operand.vmem [shape: f32[1,512], index: 10, kind: input, shape index: {}]   ;;  %s8929_s11 = inlined_call_operand.hbm [shape: f32[2,8,384], index: 11, kind: output, shape index: {}]  }
   0x1   :  { %8940 = sst [smem:[#allocation7_spill]] %s8918_s0 }
   0x2   :  { %16 = vsyncpa [#allocation5], 0 }
   0x3   :  { %18 = vsyncpa [#allocation5 + $0x1], 0  ;;  %s7715_s17 = smov 0   ;;  %s7717_s18 = smov 0  }
   0x4   :  { %s7719_s19 = smov 0   ;;  %s7721_s20 = smov 0  }
   0x5 LB: > { %s7736_s21 = sadd.s32 4294967295, %s7641_s20   ;;  %s7263_s22 = sadd.s32 4294967294, %s7641_s20   ;;  %s7641_s20 = sphi %s7721_s20, %s8952_s20   ;;  %s7637_s19 = sphi %s7719_s19, %s8951_s19   ;;  %s7633_s18 = sphi %s7717_s18, %s8950_s18   ;;  %s7629_s17 = sphi %s7715_s17, %s8949_s17  }
   0x6   : > { %s7740_s23 = sadd.s32 1, %s7641_s20   ;;  %s272_s24 = sadd.s32 1, %s7637_s19 }
   0x7   : > { %s269_s25 = ssub.s32 %s7641_s20, %s7740_s23  ;;  %p282_p0 = scmp.ne.s32.totalorder %s7637_s19, %s7633_s18 }
   0x8   : > { %p270_p1 = scmp.eq.s32.totalorder %s269_s25, 0  ;;  %p283_p2 = scmp.eq.s32.totalorder %s7736_s21, 1 }
   0x9   : > { %p288_p3 = scmp.ne.s32.totalorder %s7633_s18, %s7629_s17  ;;  %p289_p4 = scmp.eq.s32.totalorder %s7263_s22, 1 }
   0xa   : > { %s7751_s26 = scalar_select %p270_p1, %s7637_s19, %s272_s24  }
   0xb   : > { %p7753_p5 = por %p283_p2, %p282_p0  ;;  %p7757_p6 = por %p289_p4, %p288_p3 }
   0xc   : > { %p7266_p7 = scmp.ge.s32.totalorder %s7641_s20, 1  ;;  %p350_p8 = scmp.lt.s32.totalorder %s7641_s20, 3 }
   0xe   : > { %p351_p9 = pnand %p7266_p7, %p350_p8 }
   0xf   : > { %p395_p10 = scmp.lt.s32.totalorder (!%p351_p9), %s7736_s21, 1  ;;  %s8943_s0 = sld [smem:[#allocation7_spill]] (!%p351_p9) }
  0x10   : > { %354 = sbr.rel (%p351_p9) target bundleno = 1304 (0x518), region = 64  ;;  %s7644_s15 = smov (!%p351_p9), 127  }
  0x11   : > { %s7645_s16 = smov (!%p351_p9), 126   ;;  %s7646_s22 = smov (!%p351_p9), 107  }
  0x12   : > { %s8938_s24 = smov (!%p351_p9), 106   ;;  %s8934_s25 = smov (!%p351_p9), 105  }
  0x13   : > { %s8930_s12 = smov (!%p351_p9), 85   ;;  %s8936_s13 = smov (!%p351_p9), 84  }
  0x15   : > { %s7765_s29 = scalar_select %p395_p10, %s7736_s21, 1  ;;  %v7643_v0 = vmov 0.0   ;;  %v7651_v7 = vmov 0   ;;  %v2589_v8 = vld [vmem:[%s8924_s6] sm:$0xff]  ;;  %vm432_vm0 = vcmask 1039360   ;;  %v7269_v14 = vld [vmem:[%s8920_s2 + $0x8] sm:$0xff] }
  0x16   : > { %511 = vmatprep.mubr.f32.mxu0 %v7643_v0  ;;  %582 = vmatprep.mubr.f32.mxu1 %v7643_v0  ;;  %vm443_vm1 = vcmask 64512   ;;  %vm7653_vm2 = vmmov 0   ;;  %vm888_vm3 = vcmask 1031168   ;;  %v405_v24 = vld [vmem:[%s8920_s2] sm:$0xff]  ;;  %v7276_v28 = vld [vmem:[%s8920_s2 + $0x10] sm:$0xff]  ;;  %vm1133_vm4 = vcmask 875520  }
  0x17   : > { %s7512_s30 = smul.u32 48, %s7765_s29  ;;  %7565 = vset.pattern.permute.xlu0 %v7651_v7  ;;  %7566 = vset.pattern.permute.xlu1 %v7651_v7  ;;  %v7280_v39 = vld [vmem:[%s8920_s2 + $0x18] sm:$0xff]  ;;  %vm1378_vm5 = vcmask 867328   ;;  %v7284_v51 = vld [vmem:[%s8920_s2 + $0x20] sm:$0xff]  ;;  %vm1623_vm6 = vcmask 859136   ;;  %v7288_v63 = vld [vmem:[%s8920_s2 + $0x28] sm:$0xff] }
  0x18   : > { %vm1868_vm7 = vcmask 703488   ;;  %vm2113_vm8 = vcmask 695296   ;;  %vm2358_vm9 = vcmask 687104  }
  0x19   : > { %s399_s14 = scalar_lea.vmem %s8943_s0, %s7512_s30  ;;  %s8932_s30 = smov 86  }
  0x1a   : > { %v7773_v1 = vld [vmem:[%s399_s14 + $0x8] sm:$0xff]  ;;  %v7775_v2 = vld [vmem:[%s399_s14] sm:$0xff]  ;;  %v7781_v3 = vld [vmem:[%s399_s14 + $0x10] sm:$0xff] }
  0x1b   : > { %422 = vrot.lane.b32.xlu0 %v7773_v1, %s7644_s15  ;;  %420 = vrot.lane.b32.xlu1 %v7775_v2, %s7644_s15  ;;  %v7783_v4 = vld [vmem:[%s399_s14 + $0x18] sm:$0xff]  ;;  %v7789_v5 = vld [vmem:[%s399_s14 + $0x20] sm:$0xff] }
  0x1c   : > { %v413_v6 = vld [vmem:[%s399_s14 + $0x28] sm:$0xff] }
  0x1f   : > { %424 = vrot.lane.b32.xlu0 %v7781_v3, %s7644_s15  ;;  %426 = vrot.lane.b32.xlu1 %v7783_v4, %s7644_s15 }
  0x23   : > { %428 = vrot.lane.b32.xlu0 %v7789_v5, %s7644_s15  ;;  %430 = vrot.lane.b32.xlu1 %v413_v6, %s7644_s15 }
  0x27   : > { %878 = vrot.lane.b32.xlu0 %v7773_v1, %s7645_s16  ;;  %880 = vrot.lane.b32.xlu1 %v7781_v3, %s7645_s16 }
  0x2b   : > { %876 = vrot.lane.b32.xlu0 %v7775_v2, %s7645_s16  ;;  %882 = vrot.lane.b32.xlu1 %v7783_v4, %s7645_s16 }
  0x2f   : > { %884 = vrot.lane.b32.xlu0 %v7789_v5, %s7645_s16  ;;  %886 = vrot.lane.b32.xlu1 %v413_v6, %s7645_s16 }
  0x33   : > { %1123 = vrot.lane.b32.xlu0 %v7773_v1, %s7646_s22  ;;  %1125 = vrot.lane.b32.xlu1 %v7781_v3, %s7646_s22 }
  0x37   : > { %1121 = vrot.lane.b32.xlu0 %v7775_v2, %s7646_s22  ;;  %1127 = vrot.lane.b32.xlu1 %v7783_v4, %s7646_s22 }
  0x3b   : > { %1129 = vrot.lane.b32.xlu0 %v7789_v5, %s7646_s22  ;;  %1131 = vrot.lane.b32.xlu1 %v413_v6, %s7646_s22 }
  0x3f   : > { %1368 = vrot.lane.b32.xlu0 %v7773_v1, %s8938_s24  ;;  %1370 = vrot.lane.b32.xlu1 %v7781_v3, %s8938_s24 }
  0x43   : > { %1366 = vrot.lane.b32.xlu0 %v7775_v2, %s8938_s24  ;;  %1372 = vrot.lane.b32.xlu1 %v7783_v4, %s8938_s24 }
  0x47   : > { %1374 = vrot.lane.b32.xlu0 %v7789_v5, %s8938_s24  ;;  %1376 = vrot.lane.b32.xlu1 %v413_v6, %s8938_s24 }
  0x4b   : > { %1613 = vrot.lane.b32.xlu0 %v7773_v1, %s8934_s25  ;;  %1615 = vrot.lane.b32.xlu1 %v7781_v3, %s8934_s25 }
  0x4f   : > { %1611 = vrot.lane.b32.xlu0 %v7775_v2, %s8934_s25  ;;  %1617 = vrot.lane.b32.xlu1 %v7783_v4, %s8934_s25 }
  0x53   : > { %1619 = vrot.lane.b32.xlu0 %v7789_v5, %s8934_s25  ;;  %1621 = vrot.lane.b32.xlu1 %v413_v6, %s8934_s25  ;;  %s7513_s25 = smul.u32 40, %s7765_s29 }
  0x55   : > { %s404_s14 = scalar_lea.vmem %s8919_s1, %s7513_s25 }
  0x57   : > { %1858 = vrot.lane.b32.xlu0 %v7773_v1, %s8932_s30  ;;  %1860 = vrot.lane.b32.xlu1 %v7781_v3, %s8932_s30 }
  0x5b   : > { %1856 = vrot.lane.b32.xlu0 %v7775_v2, %s8932_s30  ;;  %1862 = vrot.lane.b32.xlu1 %v7783_v4, %s8932_s30 }
  0x5f   : > { %1864 = vrot.lane.b32.xlu0 %v7789_v5, %s8932_s30  ;;  %1866 = vrot.lane.b32.xlu1 %v413_v6, %s8932_s30  ;;  %s8944_s30 = smov 105  }
  0x63   : > { %2103 = vrot.lane.b32.xlu0 %v7773_v1, %s8930_s12  ;;  %2105 = vrot.lane.b32.xlu1 %v7781_v3, %s8930_s12 }
  0x67   : > { %2101 = vrot.lane.b32.xlu0 %v7775_v2, %s8930_s12  ;;  %2107 = vrot.lane.b32.xlu1 %v7783_v4, %s8930_s12 }
  0x6b   : > { %2109 = vrot.lane.b32.xlu0 %v7789_v5, %s8930_s12  ;;  %2111 = vrot.lane.b32.xlu1 %v413_v6, %s8930_s12  ;;  %s8945_s12 = smov 86  }
  0x6f   : > { %2348 = vrot.lane.b32.xlu0 %v7773_v1, %s8936_s13  ;;  %2350 = vrot.lane.b32.xlu1 %v7781_v3, %s8936_s13 }
  0x73   : > { %2346 = vrot.lane.b32.xlu0 %v7775_v2, %s8936_s13  ;;  %2352 = vrot.lane.b32.xlu1 %v7783_v4, %s8936_s13 }
  0x77   : > { %2354 = vrot.lane.b32.xlu0 %v7789_v5, %s8936_s13  ;;  %2356 = vrot.lane.b32.xlu1 %v413_v6, %s8936_s13 }
  0x7b   : > { %2592 = vperm.xlu0 %7565, %v2589_v8  }
  0x8d   : > { %v423_v9 = vpop.permute.xlu0 %422  ;;  %v421_v10 = vpop.permute.xlu1 %420 }
  0x8e   : > { %v433_v15 = vsel %vm432_vm0, %v421_v10, %v423_v9 }
  0x91   : > { %v425_v11 = vpop.permute.xlu0 %424  ;;  %v427_v12 = vpop.permute.xlu1 %426 }
  0x92   : > { %v434_v13 = vsel %vm432_vm0, %v423_v9, %v425_v11  ;;  %v435_v20 = vsel %vm432_vm0, %v425_v11, %v427_v12 }
  0x93   : > { %477 = vmatprep.subr.mxu0 %v434_v13 }
  0x94   : > { %478 = vmatpush1.msra.mxu0 %v433_v15 }
  0x95   : > { %v429_v16 = vpop.permute.xlu0 %428  ;;  %v431_v17 = vpop.permute.xlu1 %430  ;;  %7270 = vmatmul.mubr.msk.f32.vlgmr.msra.gmra.mxu0 %vm443_vm1, %v7269_v14  ;;  %7421 = vmatprep.subr.mxu0 %v7643_v0 }
  0x96   : > { %v437_v18 = vsel %vm432_vm0, %v429_v16, %v431_v17  ;;  %v436_v19 = vsel %vm432_vm0, %v427_v12, %v429_v16  ;;  %7423 = vmatprep.mubr.msk.f32.mxu0 %vm7653_vm2, %v7643_v0  ;;  %v7292_v12 = vld [vmem:[%s8920_s2 + $0x30] sm:$0xff] }
  0x97   : > { %548 = vmatprep.subr.mxu1 %v436_v19  ;;  %7422 = vmatpush3.msra.mxu0 %v437_v18 }
  0x98   : > { %549 = vmatpush1.msra.mxu1 %v435_v20  ;;  %763 = vmatprep.subr.mxu0 %v7783_v4 }
  0x99   : > { %v879_v21 = vpop.permute.xlu0 %878  ;;  %v881_v22 = vpop.permute.xlu1 %880  ;;  %7424 = vmatmul.mubr.msk.f32.vlgmr.msra.gmra.mxu0 %vm443_vm1, %v7269_v14  ;;  %7271 = vmatmul.mubr.msk.f32.vlgmr.msra.gmra.mxu1 %vm443_vm1, %v7269_v14 }
  0x9a   : > { %764 = vmatpush1.msra.mxu0 %v7781_v3  ;;  %v890_v23 = vsel %vm888_vm3, %v879_v21, %v881_v22  ;;  %692 = vmatprep.subr.mxu1 %v7773_v1 }
  0x9b   : > { %932 = vmatprep.subr.mxu0 %v890_v23  ;;  %797 = vmatprep.mubr.f32.mxu0 %v7643_v0 }
  0x9c   : > { %693 = vmatpush1.msra.mxu1 %v7775_v2  ;;  %726 = vmatprep.mubr.f32.mxu1 %v7643_v0 }
  0x9d   : > { %v877_v25 = vpop.permute.xlu0 %876  ;;  %v883_v26 = vpop.permute.xlu1 %882  ;;  %7274 = vmatmul.mubr.msk.f32.vlgmr.msra.gmra.mxu0 %vm443_vm1, %v405_v24  ;;  %7273 = vmatmul.mubr.msk.f32.vlgmr.msra.gmra.mxu1 %vm443_vm1, %v405_v24 }
  0x9e   : > { %v889_v27 = vsel %vm888_vm3, %v877_v25, %v879_v21  ;;  %7426 = vmatprep.subr.mxu1 %v7643_v0  ;;  %966 = vmatprep.mubr.f32.mxu0 %v7643_v0  ;;  %v891_v33 = vsel %vm888_vm3, %v881_v22, %v883_v26 }
  0x9f   : > { %933 = vmatpush1.msra.mxu0 %v889_v27  ;;  %7427 = vmatpush3.msra.mxu1 %v7789_v5 }
  0xa0   : > { %7431 = vmatprep.subr.mxu0 %v7643_v0  ;;  %7428 = vmatprep.mubr.msk.f32.mxu1 %vm7653_vm2, %v7643_v0 }
  0xa1   : > { %v885_v29 = vpop.permute.xlu0 %884  ;;  %v887_v30 = vpop.permute.xlu1 %886  ;;  %7277 = vmatmul.mubr.msk.f32.vlgmr.msra.gmra.mxu0 %vm443_vm1, %v7276_v28  ;;  %7429 = vmatmul.mubr.msk.f32.vlgmr.msra.gmra.mxu1 %vm443_vm1, %v405_v24  ;;  %v7296_v24 = vld [vmem:[%s8920_s2 + $0x38] sm:$0xff] }
  0xa2   : > { %v893_v31 = vsel %vm888_vm3, %v885_v29, %v887_v30  ;;  %v892_v32 = vsel %vm888_vm3, %v883_v26, %v885_v29  ;;  %1037 = vmatprep.mubr.f32.mxu1 %v7643_v0  ;;  %7433 = vmatprep.mubr.msk.f32.mxu0 %vm7653_vm2, %v7643_v0 }
  0xa3   : > { %1003 = vmatprep.subr.mxu1 %v892_v32  ;;  %7432 = vmatpush3.msra.mxu0 %v893_v31 }
  0xa4   : > { %1004 = vmatpush1.msra.mxu1 %v891_v33 }
  0xa5   : > { %v1124_v34 = vpop.permute.xlu0 %1123  ;;  %v1126_v35 = vpop.permute.xlu1 %1125  ;;  %7278 = vmatmul.mubr.msk.f32.vlgmr.msra.gmra.mxu1 %vm443_vm1, %v7276_v28  ;;  %7434 = vmatmul.mubr.msk.f32.vlgmr.msra.gmra.mxu0 %vm443_vm1, %v7276_v28 }
  0xa6   : > { %v1135_v36 = vsel %vm1133_vm4, %v1124_v34, %v1126_v35  ;;  %1211 = vmatprep.mubr.f32.mxu1 %v7643_v0  ;;  %1282 = vmatprep.mubr.f32.mxu0 %v7643_v0 }
  0xa7   : > { %1177 = vmatprep.subr.mxu1 %v1135_v36  ;;  %v7300_v36 = vld [vmem:[%s8920_s2 + $0x40] sm:$0xff] }
  0xa9   : > { %v1122_v37 = vpop.permute.xlu0 %1121  ;;  %v1128_v38 = vpop.permute.xlu1 %1127 }
  0xaa   : > { %v1134_v40 = vsel %vm1133_vm4, %v1122_v37, %v1124_v34  ;;  %v1136_v45 = vsel %vm1133_vm4, %v1126_v35, %v1128_v38 }
  0xab   : > { %1178 = vmatpush1.msra.mxu1 %v1134_v40 }
  0xac   : > { %7436 = vmatprep.subr.mxu1 %v7643_v0  ;;  %7281 = vmatmul.mubr.msk.f32.vlgmr.msra.gmra.mxu1 %vm443_vm1, %v7280_v39 }
  0xad   : > { %v1130_v41 = vpop.permute.xlu0 %1129  ;;  %v1132_v42 = vpop.permute.xlu1 %1131  ;;  %7438 = vmatprep.mubr.msk.f32.mxu1 %vm7653_vm2, %v7643_v0 }
  0xae   : > { %v1138_v43 = vsel %vm1133_vm4, %v1130_v41, %v1132_v42  ;;  %v1137_v44 = vsel %vm1133_vm4, %v1128_v38, %v1130_v41 }
  0xaf   : > { %1248 = vmatprep.subr.mxu0 %v1137_v44  ;;  %7437 = vmatpush3.msra.mxu1 %v1138_v43  ;;  %v8022_v43 = vld [vmem:[%s404_s14 + $0x8] sm:$0xff]  ;;  %v8026_v44 = vld [vmem:[%s404_s14 + $0x10] sm:$0xff] }
  0xb0   : > { %1249 = vmatpush1.msra.mxu0 %v1136_v45  ;;  %7439 = vmatmul.mubr.msk.f32.vlgmr.msra.gmra.mxu1 %vm443_vm1, %v7280_v39  ;;  %v8030_v45 = vld [vmem:[%s404_s14] sm:$0xff] }
  0xb1   : > { %v1369_v46 = vpop.permute.xlu0 %1368  ;;  %v1371_v47 = vpop.permute.xlu1 %1370  ;;  %7282 = vmatmul.mubr.msk.f32.vlgmr.msra.gmra.mxu0 %vm443_vm1, %v7280_v39  ;;  %1527 = vmatprep.mubr.f32.mxu1 %v7643_v0 }
  0xb2   : > { %v1380_v48 = vsel %vm1378_vm5, %v1369_v46, %v1371_v47  ;;  %1456 = vmatprep.mubr.f32.mxu0 %v7643_v0  ;;  %4313 = vrot.lane.b32.xlu0 %v8022_v43, %s7644_s15 }
  0xb3   : > { %1422 = vmatprep.subr.mxu0 %v1380_v48  ;;  %4315 = vrot.lane.b32.xlu1 %v8026_v44, %s7644_s15 }
  0xb5   : > { %v1367_v49 = vpop.permute.xlu0 %1366  ;;  %v1373_v50 = vpop.permute.xlu1 %1372 }
  0xb6   : > { %v1379_v52 = vsel %vm1378_vm5, %v1367_v49, %v1369_v46  ;;  %v1381_v57 = vsel %vm1378_vm5, %v1371_v47, %v1373_v50  ;;  %v8032_v46 = vld [vmem:[%s404_s14 + $0x18] sm:$0xff]  ;;  %4311 = vrot.lane.b32.xlu0 %v8030_v45, %s7644_s15  ;;  %v8038_v47 = vld [vmem:[%s404_s14 + $0x20] sm:$0xff]  ;;  %s8946_s14 = smov 85  }
  0xb7   : > { %1423 = vmatpush1.msra.mxu0 %v1379_v52  ;;  %4317 = vrot.lane.b32.xlu1 %v8032_v46, %s7644_s15 }
  0xb8   : > { %7441 = vmatprep.subr.mxu0 %v7643_v0  ;;  %7285 = vmatmul.mubr.msk.f32.vlgmr.msra.gmra.mxu0 %vm443_vm1, %v7284_v51 }
  0xb9   : > { %v1375_v53 = vpop.permute.xlu0 %1374  ;;  %v1377_v54 = vpop.permute.xlu1 %1376  ;;  %7443 = vmatprep.mubr.msk.f32.mxu0 %vm7653_vm2, %v7643_v0 }
  0xba   : > { %v1383_v55 = vsel %vm1378_vm5, %v1375_v53, %v1377_v54  ;;  %v1382_v56 = vsel %vm1378_vm5, %v1373_v50, %v1375_v53  ;;  %4319 = vrot.lane.b32.xlu0 %v8038_v47, %s7644_s15 }
  0xbb   : > { %1493 = vmatprep.subr.mxu1 %v1382_v56  ;;  %7442 = vmatpush3.msra.mxu0 %v1383_v55 }
  0xbc   : > { %1494 = vmatpush1.msra.mxu1 %v1381_v57  ;;  %7444 = vmatmul.mubr.msk.f32.vlgmr.msra.gmra.mxu0 %vm443_vm1, %v7284_v51 }
  0xbd   : > { %v1614_v58 = vpop.permute.xlu0 %1613  ;;  %v1616_v59 = vpop.permute.xlu1 %1615  ;;  %7286 = vmatmul.mubr.msk.f32.vlgmr.msra.gmra.mxu1 %vm443_vm1, %v7284_v51  ;;  %1772 = vmatprep.mubr.f32.mxu0 %v7643_v0 }
  0xbe   : > { %v1625_v60 = vsel %vm1623_vm6, %v1614_v58, %v1616_v59  ;;  %1701 = vmatprep.mubr.f32.mxu1 %v7643_v0  ;;  %4482 = vrot.lane.b32.xlu1 %v8022_v43, %s7645_s16 }
  0xbf   : > { %1667 = vmatprep.subr.mxu1 %v1625_v60  ;;  %4484 = vrot.lane.b32.xlu0 %v8026_v44, %s7645_s16 }
  0xc1   : > { %v1612_v61 = vpop.permute.xlu0 %1611  ;;  %v1618_v62 = vpop.permute.xlu1 %1617 }
  0xc2   : > { %v1624_v1 = vsel %vm1623_vm6, %v1612_v61, %v1614_v58  ;;  %v1626_v6 = vsel %vm1623_vm6, %v1616_v59, %v1618_v62  ;;  %4480 = vrot.lane.b32.xlu1 %v8030_v45, %s7645_s16 }
  0xc3   : > { %1668 = vmatpush1.msra.mxu1 %v1624_v1  ;;  %4486 = vrot.lane.b32.xlu0 %v8032_v46, %s7645_s16 }
  0xc4   : > { %7289 = vmatmul.mubr.msk.f32.vlgmr.msra.gmra.mxu1 %vm443_vm1, %v7288_v63  ;;  %7446 = vmatprep.subr.mxu1 %v7643_v0 }
  0xc5   : > { %v1620_v2 = vpop.permute.xlu0 %1619  ;;  %v1622_v3 = vpop.permute.xlu1 %1621  ;;  %7448 = vmatprep.mubr.msk.f32.mxu1 %vm7653_vm2, %v7643_v0 }
  0xc6   : > { %v1628_v4 = vsel %vm1623_vm6, %v1620_v2, %v1622_v3  ;;  %v1627_v5 = vsel %vm1623_vm6, %v1618_v62, %v1620_v2  ;;  %4488 = vrot.lane.b32.xlu1 %v8038_v47, %s7645_s16 }
  0xc7   : > { %1738 = vmatprep.subr.mxu0 %v1627_v5  ;;  %7447 = vmatpush3.msra.mxu1 %v1628_v4 }
  0xc8   : > { %1739 = vmatpush1.msra.mxu0 %v1626_v6  ;;  %7449 = vmatmul.mubr.msk.f32.vlgmr.msra.gmra.mxu1 %vm443_vm1, %v7288_v63 }
  0xc9   : > { %v1859_v7 = vpop.permute.xlu0 %1858  ;;  %7290 = vmatmul.mubr.msk.f32.vlgmr.msra.gmra.mxu0 %vm443_vm1, %v7288_v63  ;;  %v1861_v8 = vpop.permute.xlu1 %1860  ;;  %2017 = vmatprep.mubr.f32.mxu1 %v7643_v0 }
  0xca   : > { %v1870_v9 = vsel %vm1868_vm7, %v1859_v7, %v1861_v8  ;;  %1946 = vmatprep.mubr.f32.mxu0 %v7643_v0  ;;  %4651 = vrot.lane.b32.xlu0 %v8022_v43, %s7646_s22 }
  0xcb   : > { %1912 = vmatprep.subr.mxu0 %v1870_v9  ;;  %4653 = vrot.lane.b32.xlu1 %v8026_v44, %s7646_s22 }
  0xcd   : > { %v1857_v10 = vpop.permute.xlu0 %1856  ;;  %v1863_v11 = vpop.permute.xlu1 %1862 }
  0xce   : > { %v1869_v13 = vsel %vm1868_vm7, %v1857_v10, %v1859_v7  ;;  %v1871_v18 = vsel %vm1868_vm7, %v1861_v8, %v1863_v11 }
  0xcf   : > { %1913 = vmatpush1.msra.mxu0 %v1869_v13 }
  0xd0   : > { %7293 = vmatmul.mubr.msk.f32.vlgmr.msra.gmra.mxu0 %vm443_vm1, %v7292_v12  ;;  %7451 = vmatprep.subr.mxu0 %v7643_v0 }
  0xd1   : > { %v1865_v14 = vpop.permute.xlu0 %1864  ;;  %v1867_v15 = vpop.permute.xlu1 %1866  ;;  %7453 = vmatprep.mubr.msk.f32.mxu0 %vm7653_vm2, %v7643_v0 }
  0xd2   : > { %v1873_v16 = vsel %vm1868_vm7, %v1865_v14, %v1867_v15  ;;  %v1872_v17 = vsel %vm1868_vm7, %v1863_v11, %v1865_v14 }
  0xd3   : > { %1983 = vmatprep.subr.mxu1 %v1872_v17  ;;  %7452 = vmatpush3.msra.mxu0 %v1873_v16 }
  0xd4   : > { %1984 = vmatpush1.msra.mxu1 %v1871_v18  ;;  %7454 = vmatmul.mubr.msk.f32.vlgmr.msra.gmra.mxu0 %vm443_vm1, %v7292_v12 }
  0xd5   : > { %v2104_v19 = vpop.permute.xlu0 %2103  ;;  %7294 = vmatmul.mubr.msk.f32.vlgmr.msra.gmra.mxu1 %vm443_vm1, %v7292_v12  ;;  %v2106_v20 = vpop.permute.xlu1 %2105  ;;  %2262 = vmatprep.mubr.f32.mxu0 %v7643_v0 }
  0xd6   : > { %v2115_v21 = vsel %vm2113_vm8, %v2104_v19, %v2106_v20  ;;  %2191 = vmatprep.mubr.f32.mxu1 %v7643_v0 }
  0xd7   : > { %2157 = vmatprep.subr.mxu1 %v2115_v21 }
  0xd9   : > { %v2102_v22 = vpop.permute.xlu0 %2101  ;;  %v2108_v23 = vpop.permute.xlu1 %2107 }
  0xda   : > { %v2114_v25 = vsel %vm2113_vm8, %v2102_v22, %v2104_v19  ;;  %v2116_v30 = vsel %vm2113_vm8, %v2106_v20, %v2108_v23 }
  0xdb   : > { %2158 = vmatpush1.msra.mxu1 %v2114_v25 }
  0xdc   : > { %7297 = vmatmul.mubr.msk.f32.vlgmr.msra.gmra.mxu1 %vm443_vm1, %v7296_v24  ;;  %7456 = vmatprep.subr.mxu1 %v7643_v0 }
  0xdd   : > { %v2110_v26 = vpop.permute.xlu0 %2109  ;;  %v2112_v27 = vpop.permute.xlu1 %2111  ;;  %7458 = vmatprep.mubr.msk.f32.mxu1 %vm7653_vm2, %v7643_v0 }
  0xde   : > { %v2118_v28 = vsel %vm2113_vm8, %v2110_v26, %v2112_v27  ;;  %v2117_v29 = vsel %vm2113_vm8, %v2108_v23, %v2110_v26 }
  0xdf   : > { %2228 = vmatprep.subr.mxu0 %v2117_v29  ;;  %7457 = vmatpush3.msra.mxu1 %v2118_v28 }
  0xe0   : > { %2229 = vmatpush1.msra.mxu0 %v2116_v30  ;;  %7459 = vmatmul.mubr.msk.f32.vlgmr.msra.gmra.mxu1 %vm443_vm1, %v7296_v24 }
  0xe1   : > { %v2349_v31 = vpop.permute.xlu0 %2348  ;;  %7298 = vmatmul.mubr.msk.f32.vlgmr.msra.gmra.mxu0 %vm443_vm1, %v7296_v24  ;;  %v2351_v32 = vpop.permute.xlu1 %2350  ;;  %2507 = vmatprep.mubr.f32.mxu1 %v7643_v0 }
  0xe2   : > { %v2360_v33 = vsel %vm2358_vm9, %v2349_v31, %v2351_v32  ;;  %2436 = vmatprep.mubr.f32.mxu0 %v7643_v0 }
  0xe3   : > { %2402 = vmatprep.subr.mxu0 %v2360_v33 }
  0xe5   : > { %v2347_v34 = vpop.permute.xlu0 %2346  ;;  %v2353_v35 = vpop.permute.xlu1 %2352 }
  0xe6   : > { %v2359_v37 = vsel %vm2358_vm9, %v2347_v34, %v2349_v31  ;;  %v2361_v42 = vsel %vm2358_vm9, %v2351_v32, %v2353_v35 }
  0xe7   : > { %2403 = vmatpush1.msra.mxu0 %v2359_v37 }
  0xe8   : > { %7301 = vmatmul.mubr.msk.f32.vlgmr.msra.gmra.mxu0 %vm443_vm1, %v7300_v36  ;;  %7461 = vmatprep.subr.mxu0 %v7643_v0 }
  0xe9   : > { %v2355_v38 = vpop.permute.xlu0 %2354  ;;  %v2357_v39 = vpop.permute.xlu1 %2356  ;;  %7463 = vmatprep.mubr.msk.f32.mxu0 %vm7653_vm2, %v7643_v0 }
  0xea   : > { %v2363_v40 = vsel %vm2358_vm9, %v2355_v38, %v2357_v39  ;;  %v2362_v41 = vsel %vm2358_vm9, %v2353_v35, %v2355_v38 }
  0xeb   : > { %2473 = vmatprep.subr.mxu1 %v2362_v41  ;;  %7462 = vmatpush3.msra.mxu0 %v2363_v40 }
  0xec   : > { %2474 = vmatpush1.msra.mxu1 %v2361_v42  ;;  %7464 = vmatmul.mubr.msk.f32.vlgmr.msra.gmra.mxu0 %vm443_vm1, %v7300_v36 }
  0xed   : > { %7302 = vmatmul.mubr.msk.f32.vlgmr.msra.gmra.mxu1 %vm443_vm1, %v7300_v36  ;;  %2810 = vmatprep.mubr.f32.mxu0 %v7643_v0 }
  0xee   : > { %2739 = vmatprep.mubr.f32.mxu1 %v7643_v0 }
 0x155   : > { %v513_v48 = vpop.f32.mrf.mxu0 }
 0x157   : > { %v515_v49 = vpop.f32.mrf.mxu0 }
 0x159   : > { %v584_v50 = vpop.f32.mrf.mxu1  ;;  %v655_v51 = vpop.f32.mrf.mxu0 }
 0x15b   : > { %v586_v52 = vpop.f32.mrf.mxu1  ;;  %v7425_v53 = vpop.f32.mrf.mxu0 }
 0x15d   : > { %v728_v54 = vpop.f32.mrf.mxu1  ;;  %v799_v55 = vpop.f32.mrf.mxu0 }
 0x15e   : > { %v800_v56 = vadd.f32 %v799_v55, %v584_v50  ;;  %v729_v37 = vadd.f32 %v728_v54, %v513_v48 }
 0x15f   : > { %v730_v57 = vpop.f32.mrf.mxu1  ;;  %v801_v58 = vpop.f32.mrf.mxu0 }
 0x160   : > { %v731_v59 = vadd.f32 %v730_v57, %v515_v49  ;;  %v802_v60 = vadd.f32 %v801_v58, %v586_v52  ;;  %v2602_v52 = vlaneseq }
 0x161   : > { %v870_v61 = vpop.f32.mrf.mxu1  ;;  %v968_v62 = vpop.f32.mrf.mxu0 }
 0x162   : > { %v871_v63 = vadd.f32 %v870_v61, %v655_v51  ;;  %v1114_v42 = vadd.f32 %v968_v62, %v729_v37 }
 0x163   : > { %v7430_v1 = vpop.f32.mrf.mxu1  ;;  %v970_v2 = vpop.f32.mrf.mxu0 }
 0x164   : > { %v1115_v3 = vadd.f32 %v970_v2, %v731_v59 }
 0x165   : > { %v1039_v4 = vpop.f32.mrf.mxu1  ;;  %v1110_v5 = vpop.f32.mrf.mxu0 }
 0x166   : > { %v1118_v6 = vadd.f32 %v1110_v5, %v871_v63  ;;  %v1116_v53 = vadd.f32 %v1039_v4, %v800_v56  ;;  %v8068_v56 = vld [vmem:[%s8927_s9] sm:$0x1f] }
 0x167   : > { %v1041_v7 = vpop.f32.mrf.mxu1  ;;  %v7435_v8 = vpop.f32.mrf.mxu0 }
 0x168   : > { %v1117_v9 = vadd.f32 %v1041_v7, %v802_v60  ;;  %v8062_v60 = vshrl.u32 %v2602_v52, 7  ;;  %v2593_v7 = vpop.permute.xlu0 %2592 }
 0x16a   : > { %v2604_v2 = vsub.s32 0, %v8062_v60 }
 0x16c   : > { %v1213_v10 = vpop.f32.mrf.mxu1 }
 0x16d   : > { %v1359_v50 = vadd.f32 %v1213_v10, %v1114_v42 }
 0x16e   : > { %v1215_v11 = vpop.f32.mrf.mxu1 }
 0x16f   : > { %v1360_v12 = vadd.f32 %v1215_v11, %v1115_v3 }
 0x170   : > { %v1355_v13 = vpop.f32.mrf.mxu1 }
 0x171   : > { %v1284_v14 = vpop.f32.mrf.mxu0  ;;  %v1363_v15 = vadd.f32 %v1355_v13, %v1118_v6 }
 0x172   : > { %v7440_v16 = vpop.f32.mrf.mxu1  ;;  %v1361_v61 = vadd.f32 %v1284_v14, %v1116_v53  ;;  %v8184_v53 = vpop.permute.xlu1 %4315 }
 0x173   : > { %v1286_v17 = vpop.f32.mrf.mxu0 }
 0x174   : > { %v8056_v18 = vadd.f32 %v1286_v17, %v1117_v9  ;;  %v2605_v9 = vrot.slane %v8068_v56, %v2604_v2 }
 0x178   : > { %v1458_v19 = vpop.f32.mrf.mxu0 }
 0x179   : > { %v1604_v57 = vadd.f32 %v1458_v19, %v1359_v50 }
 0x17a   : > { %v1460_v20 = vpop.f32.mrf.mxu0 }
 0x17b   : > { %v1605_v21 = vadd.f32 %v1460_v20, %v1360_v12  ;;  %v2612_v12 = vsub.s32 2, %v8062_v60 }
 0x17c   : > { %v1600_v22 = vpop.f32.mrf.mxu0 }
 0x17d   : > { %v1529_v23 = vpop.f32.mrf.mxu1  ;;  %v1608_v24 = vadd.f32 %v1600_v22, %v1363_v15  ;;  %v2613_v20 = vrot.slane %v8068_v56, %v2612_v12 }
 0x17e   : > { %v7445_v25 = vpop.f32.mrf.mxu0  ;;  %v1606_v62 = vadd.f32 %v1529_v23, %v1361_v61 }
 0x17f   : > { %v1531_v26 = vpop.f32.mrf.mxu1 }
 0x184   : > { %v1703_v27 = vpop.f32.mrf.mxu1 }
 0x185   : > { %v1849_v54 = vadd.f32 %v1703_v27, %v1604_v57  ;;  %v8190_v57 = vpop.permute.xlu1 %4317 }
 0x186   : > { %v1705_v28 = vpop.f32.mrf.mxu1 }
 0x187   : > { %v8058_v29 = vadd.f32 %v1705_v28, %v1605_v21 }
 0x188   : > { %v1845_v30 = vpop.f32.mrf.mxu1 }
 0x189   : > { %v1853_v31 = vadd.f32 %v1845_v30, %v1608_v24  ;;  %v1774_v32 = vpop.f32.mrf.mxu0  ;;  %v1607_v24 = vadd.f32 %v1531_v26, %v8056_v18  ;;  %v2616_v18 = vsub.s32 3, %v8062_v60 }
 0x18a   : > { %v7450_v33 = vpop.f32.mrf.mxu1  ;;  %v1851_v5 = vadd.f32 %v1774_v32, %v1606_v62 }
 0x18b   : > { %v1776_v34 = vpop.f32.mrf.mxu0  ;;  %v2617_v37 = vrot.slane %v8068_v56, %v2616_v18 }
 0x18c   : > { %v1852_v25 = vadd.f32 %v1776_v34, %v1607_v24  ;;  %v2608_v34 = vsub.s32 1, %v8062_v60 }
 0x190   : > { %v1948_v35 = vpop.f32.mrf.mxu0 }
 0x191   : > { %v2094_v1 = vadd.f32 %v1948_v35, %v1849_v54 }
 0x192   : > { %v1950_v36 = vpop.f32.mrf.mxu0 }
 0x194   : > { %v2090_v38 = vpop.f32.mrf.mxu0 }
 0x195   : > { %v2098_v39 = vadd.f32 %v2090_v38, %v1853_v31  ;;  %v2019_v40 = vpop.f32.mrf.mxu1  ;;  %v2095_v31 = vadd.f32 %v1950_v36, %v8058_v29  ;;  %v2609_v36 = vrot.slane %v8068_v56, %v2608_v34 }
 0x196   : > { %v7455_v41 = vpop.f32.mrf.mxu0  ;;  %v2096_v10 = vadd.f32 %v2019_v40, %v1851_v5 }
 0x197   : > { %v2021_v49 = vpop.f32.mrf.mxu1  ;;  %v2620_v41 = vsub.s32 4, %v8062_v60  ;;  %v7162_v60 = vld [vmem:[%s8926_s8] sm:$0xff] }
 0x198   : > { %v2097_v27 = vadd.f32 %v2021_v49, %v1852_v25 }
 0x199   : > { %v2621_v49 = vrot.slane %v8068_v56, %v2620_v41 }
 0x19c   : > { %v2193_v51 = vpop.f32.mrf.mxu1 }
 0x19d   : > { %v2339_v4 = vadd.f32 %v2193_v51, %v2094_v1  ;;  %v8174_v51 = vpop.permute.xlu0 %4313 }
 0x19e   : > { %v2195_v55 = vpop.f32.mrf.mxu1 }
 0x19f   : > { %v2340_v26 = vadd.f32 %v2195_v55, %v2095_v31  ;;  %v8293_v31 = vld [vmem:[%s8921_s3] sm:$0xff] }
 0x1a0   : > { %v2335_v58 = vpop.f32.mrf.mxu1 }
 0x1a1   : > { %v8060_v59 = vadd.f32 %v2335_v58, %v2098_v39  ;;  %v2264_v63 = vpop.f32.mrf.mxu0  ;;  %v8178_v52 = vpop.permute.xlu0 %4311 }
 0x1a2   : > { %v7460_v48 = vpop.f32.mrf.mxu1  ;;  %v2341_v14 = vadd.f32 %v2264_v63, %v2096_v10 }
 0x1a3   : > { %v2266_v3 = vpop.f32.mrf.mxu0 }
 0x1a4   : > { %v2342_v30 = vadd.f32 %v2266_v3, %v2097_v27 }
 0x1a5   : > { %v8188_v55 = vpop.permute.xlu0 %4319 }
 0x1a8   : > { %v2438_v6 = vpop.f32.mrf.mxu0 }
 0x1a9   : > { %v2584_v8 = vadd.f32 %v2438_v6, %v2339_v4  ;;  %v8196_v58 = vpop.permute.xlu0 %4484 }
 0x1aa   : > { %v2440_v11 = vpop.f32.mrf.mxu0 }
 0x1ab   : > { %v2595_v13 = vadd.f32 %v2593_v7, %v2584_v8  ;;  %v2585_v33 = vadd.f32 %v2440_v11, %v2340_v26  ;;  %v5661_v8 = vld [vmem:[%s8925_s7] sm:$0xff] }
 0x1ac   : > { %v2580_v15 = vpop.f32.mrf.mxu0 }
 0x1ad   : > { %v8074_v16 = vmul.f32 %v2605_v9, %v2595_v13  ;;  %v2509_v17 = vpop.f32.mrf.mxu1  ;;  %v2596_v29 = vadd.f32 %v2593_v7, %v2585_v33  ;;  %v2588_v40 = vadd.f32 %v2580_v15, %v8060_v59  ;;  %v8201_v59 = vpop.permute.xlu1 %4482 }
 0x1ae   : > { %v2586_v19 = vadd.f32 %v2509_v17, %v2341_v14  ;;  %v7465_v21 = vpop.f32.mrf.mxu0  ;;  %v8207_v61 = vpop.permute.xlu0 %4486 }
 0x1af   : > { %2654 = vrot.lane.b32.xlu0 %v8074_v16, %s7644_s15  ;;  %v2511_v28 = vpop.f32.mrf.mxu1  ;;  %v8127_v39 = vmul.f32 %v2609_v36, %v2596_v29  ;;  %v2599_v42 = vadd.f32 %v2593_v7, %v2588_v40  ;;  %v8319_v40 = vld [vmem:[%s8921_s3 + $0x18] sm:$0xff] }
 0x1b0   : > { %v2597_v22 = vadd.f32 %v2593_v7, %v2586_v19  ;;  %v2587_v32 = vadd.f32 %v2511_v28, %v2342_v30  ;;  %v8281_v28 = vld [vmem:[%s8921_s3 + $0x8] sm:$0xff] }
 0x1b1   : > { %v2631_v50 = vmul.f32 %v2621_v49, %v2599_v42  ;;  %v8209_v63 = vpop.permute.xlu1 %4480 }
 0x1b2   : > { %v8081_v23 = vmul.f32 %v2613_v20, %v2597_v22  ;;  %v2598_v35 = vadd.f32 %v2593_v7, %v2587_v32  ;;  %v8216_v54 = vpop.permute.xlu0 %4651 }
 0x1b4   : > { %2968 = vrot.lane.b32.xlu0 %v8081_v23, %s7645_s16  ;;  %2658 = vrot.lane.b32.xlu1 %v8081_v23, %s7644_s15  ;;  %v8121_v38 = vmul.f32 %v2617_v37, %v2598_v35 }
 0x1b5   : > { %v8214_v48 = vpop.permute.xlu1 %4488 }
 0x1b8   : > { %3133 = vrot.lane.b32.xlu0 %v8074_v16, %s7646_s22  ;;  %2964 = vrot.lane.b32.xlu1 %v8074_v16, %s7645_s16 }
 0x1b9   : > { %v8226_v1 = vpop.permute.xlu1 %4653 }
 0x1bc   : > { %3306 = vrot.lane.b32.xlu0 %v8081_v23, %s8938_s24  ;;  %3137 = vrot.lane.b32.xlu1 %v8081_v23, %s7646_s22 }
 0x1c0   : > { %3471 = vrot.lane.b32.xlu0 %v8074_v16, %s8944_s30  ;;  %3302 = vrot.lane.b32.xlu1 %v8074_v16, %s8938_s24 }
 0x1c4   : > { %3644 = vrot.lane.b32.xlu0 %v8081_v23, %s8945_s12  ;;  %3475 = vrot.lane.b32.xlu1 %v8081_v23, %s8944_s30 }
 0x1c8   : > { %3809 = vrot.lane.b32.xlu0 %v8074_v16, %s8946_s14  ;;  %3640 = vrot.lane.b32.xlu1 %v8074_v16, %s8945_s12 }
 0x1cc   : > { %3982 = vrot.lane.b32.xlu0 %v8081_v23, %s8936_s13  ;;  %3813 = vrot.lane.b32.xlu1 %v8081_v23, %s8946_s14 }
 0x1d0   : > { %3978 = vrot.lane.b32.xlu1 %v8074_v16, %s8936_s13  ;;  %2970 = vrot.lane.b32.xlu0 %v8121_v38, %s7645_s16 }
 0x1d4   : > { %2656 = vrot.lane.b32.xlu1 %v8127_v39, %s7644_s15  ;;  %3135 = vrot.lane.b32.xlu0 %v8127_v39, %s7646_s22 }
 0x1d8   : > { %3308 = vrot.lane.b32.xlu0 %v8121_v38, %s8938_s24  ;;  %2660 = vrot.lane.b32.xlu1 %v8121_v38, %s7644_s15 }
 0x1dc   : > { %3473 = vrot.lane.b32.xlu0 %v8127_v39, %s8944_s30  ;;  %2966 = vrot.lane.b32.xlu1 %v8127_v39, %s7645_s16 }
 0x1e0   : > { %3646 = vrot.lane.b32.xlu0 %v8121_v38, %s8945_s12  ;;  %3139 = vrot.lane.b32.xlu1 %v8121_v38, %s7646_s22 }
 0x1e4   : > { %3811 = vrot.lane.b32.xlu0 %v8127_v39, %s8946_s14  ;;  %3304 = vrot.lane.b32.xlu1 %v8127_v39, %s8938_s24 }
 0x1e8   : > { %3984 = vrot.lane.b32.xlu0 %v8121_v38, %s8936_s13  ;;  %3477 = vrot.lane.b32.xlu1 %v8121_v38, %s8944_s30 }
 0x1ec   : > { %3642 = vrot.lane.b32.xlu1 %v8127_v39, %s8945_s12  ;;  %2662 = vrot.lane.b32.xlu0 %v2631_v50, %s7644_s15 }
 0x1f0   : > { %3815 = vrot.lane.b32.xlu1 %v8121_v38, %s8946_s14  ;;  %4649 = vrot.lane.b32.xlu0 %v8030_v45, %s7646_s22 }
 0x1f4   : > { %3980 = vrot.lane.b32.xlu1 %v8127_v39, %s8936_s13  ;;  %4657 = vrot.lane.b32.xlu0 %v8038_v47, %s7646_s22 }
 0x1f8   : > { %4655 = vrot.lane.b32.xlu1 %v8032_v46, %s7646_s22  ;;  %3141 = vrot.lane.b32.xlu0 %v2631_v50, %s7646_s22 }
 0x1fc   : > { %4820 = vrot.lane.b32.xlu1 %v8022_v43, %s8938_s24  ;;  %4822 = vrot.lane.b32.xlu0 %v8026_v44, %s8938_s24 }
 0x200   : > { %2972 = vrot.lane.b32.xlu1 %v2631_v50, %s7645_s16  ;;  %3479 = vrot.lane.b32.xlu0 %v2631_v50, %s8944_s30 }
 0x204   : > { %4818 = vrot.lane.b32.xlu1 %v8030_v45, %s8938_s24  ;;  %4824 = vrot.lane.b32.xlu0 %v8032_v46, %s8938_s24 }
 0x208   : > { %3310 = vrot.lane.b32.xlu1 %v2631_v50, %s8938_s24  ;;  %3817 = vrot.lane.b32.xlu0 %v2631_v50, %s8946_s14 }
 0x20c   : > { %4826 = vrot.lane.b32.xlu1 %v8038_v47, %s8938_s24  ;;  %4989 = vrot.lane.b32.xlu0 %v8022_v43, %s8944_s30  ;;  %s8947_s24 = smov 106  }
 0x210   : > { %3648 = vrot.lane.b32.xlu1 %v2631_v50, %s8945_s12  ;;  %4987 = vrot.lane.b32.xlu0 %v8030_v45, %s8944_s30 }
 0x214   : > { %4991 = vrot.lane.b32.xlu1 %v8026_v44, %s8944_s30  ;;  %4995 = vrot.lane.b32.xlu0 %v8038_v47, %s8944_s30 }
 0x218   : > { %3986 = vrot.lane.b32.xlu1 %v2631_v50, %s8936_s13  ;;  %5160 = vrot.lane.b32.xlu0 %v8026_v44, %s8945_s12 }
 0x21c   : > { %4993 = vrot.lane.b32.xlu1 %v8032_v46, %s8944_s30  ;;  %5162 = vrot.lane.b32.xlu0 %v8032_v46, %s8945_s12 }
 0x220   : > { %5158 = vrot.lane.b32.xlu1 %v8022_v43, %s8945_s12  ;;  %5327 = vrot.lane.b32.xlu0 %v8022_v43, %s8946_s14 }
 0x221   : > { %v2655_v62 = vpop.permute.xlu0 %2654 }
 0x224   : > { %5156 = vrot.lane.b32.xlu1 %v8030_v45, %s8945_s12  ;;  %5325 = vrot.lane.b32.xlu0 %v8030_v45, %s8946_s14 }
 0x226   : > { %v8232_v3 = vpop.permute.xlu0 %2968  ;;  %v8234_v56 = vpop.permute.xlu1 %2658 }
 0x228   : > { %5164 = vrot.lane.b32.xlu1 %v8038_v47, %s8945_s12  ;;  %5333 = vrot.lane.b32.xlu0 %v8038_v47, %s8946_s14 }
 0x22a   : > { %v3134_v4 = vpop.permute.xlu0 %3133  ;;  %v2965_v5 = vpop.permute.xlu1 %2964 }
 0x22c   : > { %5329 = vrot.lane.b32.xlu1 %v8026_v44, %s8946_s14  ;;  %5498 = vrot.lane.b32.xlu0 %v8026_v44, %s8936_s13 }
 0x22e   : > { %v8244_v6 = vpop.permute.xlu0 %3306  ;;  %v8246_v7 = vpop.permute.xlu1 %3137 }
 0x230   : > { %5331 = vrot.lane.b32.xlu1 %v8032_v46, %s8946_s14  ;;  %5500 = vrot.lane.b32.xlu0 %v8032_v46, %s8936_s13 }
 0x232   : > { %v3472_v9 = vpop.permute.xlu0 %3471  ;;  %v3303_v10 = vpop.permute.xlu1 %3302 }
 0x234   : > { %5496 = vrot.lane.b32.xlu1 %v8022_v43, %s8936_s13  ;;  %5664 = vperm.xlu0 %7565, %v5661_v8  }
 0x236   : > { %v8257_v11 = vpop.permute.xlu0 %3644  ;;  %v8259_v13 = vpop.permute.xlu1 %3475 }
 0x238   : > { %5494 = vrot.lane.b32.xlu1 %v8030_v45, %s8936_s13 }
 0x23a   : > { %v8263_v14 = vpop.permute.xlu0 %3809  ;;  %v3641_v15 = vpop.permute.xlu1 %3640 }
 0x23c   : > { %5502 = vrot.lane.b32.xlu1 %v8038_v47, %s8936_s13  ;;  %s8948_s13 = smov 84  }
 0x23e   : > { %v8267_v17 = vpop.permute.xlu0 %3982  ;;  %v8269_v19 = vpop.permute.xlu1 %3813 }
 0x242   : > { %v8271_v20 = vpop.permute.xlu0 %2970  ;;  %v8273_v21 = vpop.permute.xlu1 %3978 }
 0x246   : > { %v3136_v22 = vpop.permute.xlu0 %3135  ;;  %v2657_v24 = vpop.permute.xlu1 %2656 }
 0x247   : > { %v2664_v25 = vsel %vm432_vm0, %v2655_v62, %v2657_v24  ;;  %v2665_v27 = vsel %vm432_vm0, %v2657_v24, %v8234_v56  ;;  %v3144_v37 = vsel %vm1133_vm4, %v3136_v22, %v8246_v7  ;;  %v3143_v29 = vsel %vm1133_vm4, %v3134_v4, %v3136_v22  ;;  %v8330_v62 = vld [vmem:[%s8921_s3 + $0x20] sm:$0xff]  ;;  %v8345_v22 = vld [vmem:[%s8921_s3 + $0x28] sm:$0xff] }
 0x248   : > { %2705 = vmatprep.subr.mxu1 %v2665_v27 }
 0x249   : > { %2706 = vmatpush1.msra.mxu1 %v2664_v25 }
 0x24a   : > { %v8283_v47 = vpop.permute.xlu0 %3308  ;;  %7305 = vmatmul.mubr.msk.f32.vlgmr.msra.gmra.mxu1 %vm443_vm1, %v8281_v28  ;;  %2850 = vmatprep.subr.mxu1 %v8127_v39  ;;  %v2661_v30 = vpop.permute.xlu1 %2660 }
 0x24b   : > { %2851 = vmatpush1.msra.mxu1 %v8074_v16  ;;  %2884 = vmatprep.mubr.f32.mxu1 %v7643_v0  ;;  %v8304_v16 = vld [vmem:[%s8921_s3 + $0x10] sm:$0xff] }
 0x24e   : > { %v3474_v32 = vpop.permute.xlu0 %3473  ;;  %7307 = vmatmul.mubr.msk.f32.vlgmr.msra.gmra.mxu1 %vm443_vm1, %v8293_v31  ;;  %v2967_v26 = vpop.permute.xlu1 %2966 }
 0x24f   : > { %v2974_v33 = vsel %vm888_vm3, %v2965_v5, %v2967_v26  ;;  %v2975_v35 = vsel %vm888_vm3, %v2967_v26, %v8232_v3  ;;  %3049 = vmatprep.mubr.f32.mxu1 %v7643_v0  ;;  %v3482_v4 = vsel %vm1623_vm6, %v3474_v32, %v8259_v13  ;;  %v3481_v5 = vsel %vm1623_vm6, %v3472_v9, %v3474_v32  ;;  %v8357_v26 = vld [vmem:[%s8921_s3 + $0x30] sm:$0xff] }
 0x250   : > { %3015 = vmatprep.subr.mxu1 %v2975_v35 }
 0x251   : > { %3016 = vmatpush1.msra.mxu1 %v2974_v33  ;;  %v2666_v33 = vsel %vm432_vm0, %v8234_v56, %v2661_v30  ;;  %v8375_v56 = vld [vmem:[%s8921_s3 + $0x38] sm:$0xff] }
 0x252   : > { %v8309_v36 = vpop.permute.xlu0 %3646  ;;  %7310 = vmatmul.mubr.msk.f32.vlgmr.msra.gmra.mxu1 %vm443_vm1, %v8304_v16  ;;  %3184 = vmatprep.subr.mxu1 %v3144_v37  ;;  %v8313_v39 = vpop.permute.xlu1 %3139 }
 0x253   : > { %3185 = vmatpush1.msra.mxu1 %v3143_v29  ;;  %3218 = vmatprep.mubr.f32.mxu1 %v7643_v0 }
 0x256   : > { %v3812_v41 = vpop.permute.xlu0 %3811  ;;  %7313 = vmatmul.mubr.msk.f32.vlgmr.msra.gmra.mxu1 %vm443_vm1, %v8319_v40  ;;  %v3305_v42 = vpop.permute.xlu1 %3304 }
 0x257   : > { %v3312_v49 = vsel %vm1378_vm5, %v3303_v10, %v3305_v42  ;;  %v3313_v50 = vsel %vm1378_vm5, %v3305_v42, %v8244_v6  ;;  %3387 = vmatprep.mubr.f32.mxu1 %v7643_v0  ;;  %v3820_v35 = vsel %vm2113_vm8, %v3812_v41, %v8269_v19  ;;  %v3819_v29 = vsel %vm2113_vm8, %v8263_v14, %v3812_v41 }
 0x258   : > { %3353 = vmatprep.subr.mxu1 %v3313_v50  ;;  %v4322_v42 = vsel %vm432_vm0, %v8174_v51, %v8184_v53  ;;  %v4491_v50 = vsel %vm888_vm3, %v8201_v59, %v8196_v58 }
 0x259   : > { %3354 = vmatpush1.msra.mxu1 %v3312_v49 }
 0x25a   : > { %v8335_v8 = vpop.permute.xlu0 %3984  ;;  %7316 = vmatmul.mubr.msk.f32.vlgmr.msra.gmra.mxu1 %vm443_vm1, %v8330_v62  ;;  %3522 = vmatprep.subr.mxu1 %v3482_v4  ;;  %v8339_v10 = vpop.permute.xlu1 %3477  ;;  %v8426_v4 = vld [vmem:[%s8922_s4 + $0x8] sm:$0xff] }
 0x25b   : > { %3523 = vmatpush1.msra.mxu1 %v3481_v5  ;;  %3556 = vmatprep.mubr.f32.mxu1 %v7643_v0 }
 0x25e   : > { %v2663_v24 = vpop.permute.xlu0 %2662  ;;  %7319 = vmatmul.mubr.msk.f32.vlgmr.msra.gmra.mxu1 %vm443_vm1, %v8345_v22  ;;  %v3643_v9 = vpop.permute.xlu1 %3642 }
 0x25f   : > { %v3650_v25 = vsel %vm1868_vm7, %v3641_v15, %v3643_v9  ;;  %v2667_v27 = vsel %vm432_vm0, %v2661_v30, %v2663_v24  ;;  %v3651_v32 = vsel %vm1868_vm7, %v3643_v9, %v8257_v11  ;;  %3725 = vmatprep.mubr.f32.mxu1 %v7643_v0  ;;  %v4660_v24 = vsel %vm1133_vm4, %v8216_v54, %v8226_v1 }
 0x260   : > { %2776 = vmatprep.subr.mxu0 %v2667_v27  ;;  %3691 = vmatprep.subr.mxu1 %v3651_v32  ;;  %v3145_v27 = vsel %vm1133_vm4, %v8246_v7, %v8313_v39  ;;  %v8466_v7 = vld [vmem:[%s8922_s4 + $0x18] sm:$0xff] }
 0x261   : > { %2777 = vmatpush1.msra.mxu0 %v2666_v33  ;;  %3692 = vmatpush1.msra.mxu1 %v3650_v25  ;;  %v2976_v25 = vsel %vm888_vm3, %v8232_v3, %v8271_v20 }
 0x262   : > { %v4650_v15 = vpop.permute.xlu0 %4649  ;;  %2921 = vmatprep.subr.mxu0 %v8121_v38  ;;  %7322 = vmatmul.mubr.msk.f32.vlgmr.msra.gmra.mxu1 %vm443_vm1, %v8357_v26  ;;  %v8366_v37 = vpop.permute.xlu1 %3815 }
 0x263   : > { %3860 = vmatprep.subr.mxu1 %v3820_v35  ;;  %7306 = vmatmul.mubr.msk.f32.vlgmr.msra.gmra.mxu0 %vm443_vm1, %v8281_v28  ;;  %v3314_v35 = vsel %vm1378_vm5, %v8244_v6, %v8283_v47 }
 0x264   : > { %2922 = vmatpush1.msra.mxu0 %v8081_v23  ;;  %3861 = vmatpush1.msra.mxu1 %v3819_v29  ;;  %v8392_v23 = vld [vmem:[%s8921_s3 + $0x40] sm:$0xff] }
 0x265   : > { %3894 = vmatprep.mubr.f32.mxu1 %v7643_v0  ;;  %2955 = vmatprep.mubr.f32.mxu0 %v7643_v0  ;;  %v8486_v29 = vld [vmem:[%s8922_s4 + $0x20] sm:$0xff] }
 0x266   : > { %v8380_v38 = vpop.permute.xlu0 %4657  ;;  %7325 = vmatmul.mubr.msk.f32.vlgmr.msra.gmra.mxu1 %vm443_vm1, %v8375_v56  ;;  %v3981_v14 = vpop.permute.xlu1 %3980 }
 0x267   : > { %v3988_v28 = vsel %vm2358_vm9, %v8273_v21, %v3981_v14  ;;  %v3989_v30 = vsel %vm2358_vm9, %v3981_v14, %v8267_v17  ;;  %4063 = vmatprep.mubr.f32.mxu1 %v7643_v0  ;;  %7308 = vmatmul.mubr.msk.f32.vlgmr.msra.gmra.mxu0 %vm443_vm1, %v8293_v31  ;;  %v8410_v31 = vld [vmem:[%s8922_s4] sm:$0xff]  ;;  %v3483_v14 = vsel %vm1623_vm6, %v8259_v13, %v8339_v10 }
 0x268   : > { %4029 = vmatprep.subr.mxu1 %v3989_v30  ;;  %3120 = vmatprep.mubr.f32.mxu0 %v7643_v0 }
 0x269   : > { %4030 = vmatpush1.msra.mxu1 %v3988_v28 }
 0x26a   : > { %v3142_v41 = vpop.permute.xlu0 %3141  ;;  %7328 = vmatmul.mubr.msk.f32.vlgmr.msra.gmra.mxu1 %vm443_vm1, %v8392_v23  ;;  %4183 = vmatprep.subr.mxu1 %v8022_v43  ;;  %v8400_v21 = vpop.permute.xlu1 %4655  ;;  %v4321_v43 = vsel %vm432_vm0, %v8178_v52, %v8174_v51  ;;  %v4490_v51 = vsel %vm888_vm3, %v8209_v63, %v8201_v59  ;;  %v8445_v59 = vld [vmem:[%s8922_s4 + $0x10] sm:$0xff] }
 0x26b   : > { %4184 = vmatpush1.msra.mxu1 %v8030_v45  ;;  %4217 = vmatprep.mubr.f32.mxu1 %v7643_v0  ;;  %v3146_v63 = vsel %vm1133_vm4, %v8313_v39, %v3142_v41 }
 0x26c   : > { %4362 = vmatprep.subr.mxu1 %v4322_v42 }
 0x26e   : > { %v8415_v49 = vpop.permute.xlu0 %4822  ;;  %7330 = vmatmul.mubr.msk.f32.vlgmr.msra.gmra.mxu1 %vm443_vm1, %v8410_v31  ;;  %v4821_v45 = vpop.permute.xlu1 %4820 }
 0x26f   : > { %4363 = vmatpush1.msra.mxu1 %v4321_v43  ;;  %4396 = vmatprep.mubr.f32.mxu1 %v7643_v0  ;;  %v4829_v33 = vsel %vm1378_vm5, %v4821_v45, %v8415_v49 }
 0x270   : > { %4531 = vmatprep.subr.mxu1 %v4491_v50 }
 0x272   : > { %v3480_v52 = vpop.permute.xlu0 %3479  ;;  %7333 = vmatmul.mubr.msk.f32.vlgmr.msra.gmra.mxu1 %vm443_vm1, %v8426_v4  ;;  %v2973_v5 = vpop.permute.xlu1 %2972 }
 0x273   : > { %4532 = vmatpush1.msra.mxu1 %v4490_v51  ;;  %v2977_v9 = vsel %vm888_vm3, %v8271_v20, %v2973_v5  ;;  %4565 = vmatprep.mubr.f32.mxu1 %v7643_v0  ;;  %v4659_v20 = vsel %vm1133_vm4, %v4650_v15, %v8216_v54  ;;  %v4324_v51 = vsel %vm432_vm0, %v8190_v57, %v8188_v55 }
 0x274   : > { %4700 = vmatprep.subr.mxu1 %v4660_v24  ;;  %3086 = vmatprep.subr.mxu0 %v2977_v9 }
 0x275   : > { %3087 = vmatpush1.msra.mxu0 %v2976_v25  ;;  %v7350_v25 = vld [vmem:[%s8922_s4 + $0x38] sm:$0xff] }
 0x276   : > { %v8452_v32 = vpop.permute.xlu0 %4824  ;;  %7311 = vmatmul.mubr.msk.f32.vlgmr.msra.gmra.mxu0 %vm443_vm1, %v8304_v16  ;;  %3255 = vmatprep.subr.mxu0 %v3146_v63  ;;  %v4819_v3 = vpop.permute.xlu1 %4818 }
 0x277   : > { %7336 = vmatmul.mubr.msk.f32.vlgmr.msra.gmra.mxu1 %vm443_vm1, %v8445_v59  ;;  %3256 = vmatpush1.msra.mxu0 %v3145_v27  ;;  %v4828_v39 = vsel %vm1378_vm5, %v4819_v3, %v4821_v45  ;;  %v3990_v45 = vsel %vm2358_vm9, %v8267_v17, %v8335_v8  ;;  %v4323_v17 = vsel %vm432_vm0, %v8184_v53, %v8190_v57 }
 0x278   : > { %4701 = vmatpush1.msra.mxu1 %v4659_v20  ;;  %3289 = vmatprep.mubr.f32.mxu0 %v7643_v0  ;;  %v4492_v53 = vsel %vm888_vm3, %v8196_v58, %v8207_v61  ;;  %v4661_v58 = vsel %vm1133_vm4, %v8226_v1, %v8400_v21 }
 0x279   : > { %4869 = vmatprep.subr.mxu1 %v4829_v33  ;;  %4734 = vmatprep.mubr.f32.mxu1 %v7643_v0 }
 0x27a   : > { %v3818_v16 = vpop.permute.xlu0 %3817  ;;  %7314 = vmatmul.mubr.msk.f32.vlgmr.msra.gmra.mxu0 %vm443_vm1, %v8319_v40  ;;  %v3311_v54 = vpop.permute.xlu1 %3310  ;;  %v3484_v40 = vsel %vm1623_vm6, %v8339_v10, %v3480_v52  ;;  %v3652_v10 = vsel %vm1868_vm7, %v8257_v11, %v8309_v36  ;;  %v4830_v52 = vsel %vm1378_vm5, %v8415_v49, %v8452_v32 }
 0x27b   : > { %7339 = vmatmul.mubr.msk.f32.vlgmr.msra.gmra.mxu1 %vm443_vm1, %v8466_v7  ;;  %v3315_v15 = vsel %vm1378_vm5, %v8283_v47, %v3311_v54  ;;  %3458 = vmatprep.mubr.f32.mxu0 %v7643_v0  ;;  %v3822_v30 = vsel %vm2113_vm8, %v8366_v37, %v3818_v16  ;;  %v7353_v54 = vld [vmem:[%s8922_s4 + $0x40] sm:$0xff] }
 0x27c   : > { %4870 = vmatpush1.msra.mxu1 %v4828_v39  ;;  %3424 = vmatprep.subr.mxu0 %v3315_v15 }
 0x27d   : > { %3425 = vmatpush1.msra.mxu0 %v3314_v35  ;;  %4903 = vmatprep.mubr.f32.mxu1 %v7643_v0 }
 0x27e   : > { %7317 = vmatmul.mubr.msk.f32.vlgmr.msra.gmra.mxu0 %vm443_vm1, %v8330_v62  ;;  %3593 = vmatprep.subr.mxu0 %v3484_v40  ;;  %v8493_v6 = vpop.permute.xlu1 %4826  ;;  %v4990_v47 = vpop.permute.xlu0 %4989 }
 0x27f   : > { %3594 = vmatpush1.msra.mxu0 %v3483_v14  ;;  %3627 = vmatprep.mubr.f32.mxu0 %v7643_v0 }
 0x280   : > { %7342 = vmatmul.mubr.msk.f32.vlgmr.msra.gmra.mxu1 %vm443_vm1, %v8486_v29 }
 0x281   : > { %5072 = vmatprep.mubr.f32.mxu1 %v7643_v0 }
 0x282   : > { %7320 = vmatmul.mubr.msk.f32.vlgmr.msra.gmra.mxu0 %vm443_vm1, %v8345_v22  ;;  %v3649_v28 = vpop.permute.xlu1 %3648  ;;  %v4988_v13 = vpop.permute.xlu0 %4987  ;;  %v3821_v22 = vsel %vm2113_vm8, %v8269_v19, %v8366_v37 }
 0x283   : > { %v3653_v62 = vsel %vm1868_vm7, %v8309_v36, %v3649_v28  ;;  %3796 = vmatprep.mubr.f32.mxu0 %v7643_v0  ;;  %v4997_v42 = vsel %vm1623_vm6, %v4988_v13, %v4990_v47  ;;  %v8523_v36 = vld [vmem:[%s8922_s4 + $0x28] sm:$0xff] }
 0x284   : > { %3762 = vmatprep.subr.mxu0 %v3653_v62 }
 0x285   : > { %3763 = vmatpush1.msra.mxu0 %v3652_v10 }
 0x286   : > { %7323 = vmatmul.mubr.msk.f32.vlgmr.msra.gmra.mxu0 %vm443_vm1, %v8357_v26  ;;  %3931 = vmatprep.subr.mxu0 %v3822_v30  ;;  %v8514_v41 = vpop.permute.xlu1 %4991  ;;  %v4996_v43 = vpop.permute.xlu0 %4995 }
 0x287   : > { %3932 = vmatpush1.msra.mxu0 %v3821_v22  ;;  %v4998_v11 = vsel %vm1623_vm6, %v4990_v47, %v8514_v41  ;;  %3965 = vmatprep.mubr.f32.mxu0 %v7643_v0 }
 0x288   : > { %5038 = vmatprep.subr.mxu1 %v4998_v11 }
 0x289   : > { %5039 = vmatpush1.msra.mxu1 %v4997_v42 }
 0x28a   : > { %7326 = vmatmul.mubr.msk.f32.vlgmr.msra.gmra.mxu0 %vm443_vm1, %v8375_v56  ;;  %7345 = vmatmul.mubr.msk.f32.vlgmr.msra.gmra.mxu1 %vm443_vm1, %v8523_v36  ;;  %v3987_v19 = vpop.permute.xlu1 %3986  ;;  %v8529_v26 = vpop.permute.xlu0 %5160 }
 0x28b   : > { %v3991_v37 = vsel %vm2358_vm9, %v8335_v8, %v3987_v19  ;;  %4134 = vmatprep.mubr.f32.mxu0 %v7643_v0  ;;  %5241 = vmatprep.mubr.f32.mxu1 %v7643_v0 }
 0x28c   : > { %4100 = vmatprep.subr.mxu0 %v3991_v37 }
 0x28d   : > { %4101 = vmatpush1.msra.mxu0 %v3990_v45 }
 0x28e   : > { %7329 = vmatmul.mubr.msk.f32.vlgmr.msra.gmra.mxu0 %vm443_vm1, %v8392_v23  ;;  %4254 = vmatprep.subr.mxu0 %v8032_v46  ;;  %v4994_v56 = vpop.permute.xlu1 %4993  ;;  %v5163_v50 = vpop.permute.xlu0 %5162  ;;  %v7347_v23 = vld [vmem:[%s8922_s4 + $0x30] sm:$0xff] }
 0x28f   : > { %4255 = vmatpush1.msra.mxu0 %v8026_v44  ;;  %4288 = vmatprep.mubr.f32.mxu0 %v7643_v0  ;;  %v4493_v44 = vsel %vm888_vm3, %v8207_v61, %v8214_v48  ;;  %v5000_v24 = vsel %vm1623_vm6, %v4994_v56, %v4996_v43  ;;  %v4999_v49 = vsel %vm1623_vm6, %v8514_v41, %v4994_v56 }
 0x290   : > { %4433 = vmatprep.subr.mxu0 %v4324_v51 }
 0x292   : > { %7331 = vmatmul.mubr.msk.f32.vlgmr.msra.gmra.mxu0 %vm443_vm1, %v8410_v31  ;;  %v5159_v8 = vpop.permute.xlu1 %5158  ;;  %v5328_v46 = vpop.permute.xlu0 %5327  ;;  %v4662_v31 = vsel %vm1133_vm4, %v8400_v21, %v8380_v38  ;;  %v4831_v38 = vsel %vm1378_vm5, %v8452_v32, %v8493_v6  ;;  %v5168_v32 = vsel %vm1868_vm7, %v8529_v26, %v5163_v50 }
 0x293   : > { %4434 = vmatpush1.msra.mxu0 %v4323_v17  ;;  %v5167_v55 = vsel %vm1868_vm7, %v5159_v8, %v8529_v26  ;;  %4467 = vmatprep.mubr.f32.mxu0 %v7643_v0 }
 0x294   : > { %4602 = vmatprep.subr.mxu0 %v4493_v44  ;;  %5207 = vmatprep.subr.mxu1 %v5167_v55 }
 0x296   : > { %7334 = vmatmul.mubr.msk.f32.vlgmr.msra.gmra.mxu0 %vm443_vm1, %v8426_v4  ;;  %v5157_v57 = vpop.permute.xlu1 %5156  ;;  %v5326_v4 = vpop.permute.xlu0 %5325 }
 0x297   : > { %4603 = vmatpush1.msra.mxu0 %v4492_v53  ;;  %v5166_v48 = vsel %vm1868_vm7, %v5157_v57, %v5159_v8  ;;  %4636 = vmatprep.mubr.f32.mxu0 %v7643_v0  ;;  %v5335_v1 = vsel %vm2113_vm8, %v5326_v4, %v5328_v46 }
 0x298   : > { %4771 = vmatprep.subr.mxu0 %v4662_v31  ;;  %5208 = vmatpush1.msra.mxu1 %v5166_v48 }
 0x299   : > { %7348 = vmatmul.mubr.msk.f32.vlgmr.msra.gmra.mxu1 %vm443_vm1, %v7347_v23 }
 0x29a   : > { %7337 = vmatmul.mubr.msk.f32.vlgmr.msra.gmra.mxu0 %vm443_vm1, %v8445_v59  ;;  %v5165_v61 = vpop.permute.xlu1 %5164  ;;  %5410 = vmatprep.mubr.f32.mxu1 %v7643_v0  ;;  %v5334_v5 = vpop.permute.xlu0 %5333 }
 0x29b   : > { %4772 = vmatpush1.msra.mxu0 %v4661_v58  ;;  %4805 = vmatprep.mubr.f32.mxu0 %v7643_v0  ;;  %v5169_v63 = vsel %vm1868_vm7, %v5163_v50, %v5165_v61 }
 0x29c   : > { %4940 = vmatprep.subr.mxu0 %v4831_v38 }
 0x29e   : > { %7340 = vmatmul.mubr.msk.f32.vlgmr.msra.gmra.mxu0 %vm443_vm1, %v8466_v7  ;;  %v5330_v21 = vpop.permute.xlu1 %5329  ;;  %v5499_v27 = vpop.permute.xlu0 %5498 }
 0x29f   : > { %4941 = vmatpush1.msra.mxu0 %v4830_v52  ;;  %v5336_v9 = vsel %vm2113_vm8, %v5328_v46, %v5330_v21  ;;  %4974 = vmatprep.mubr.f32.mxu0 %v7643_v0 }
 0x2a0   : > { %5109 = vmatprep.subr.mxu0 %v5000_v24  ;;  %5376 = vmatprep.subr.mxu1 %v5336_v9 }
 0x2a1   : > { %5377 = vmatpush1.msra.mxu1 %v5335_v1 }
 0x2a2   : > { %7343 = vmatmul.mubr.msk.f32.vlgmr.msra.gmra.mxu0 %vm443_vm1, %v8486_v29  ;;  %7351 = vmatmul.mubr.msk.f32.vlgmr.msra.gmra.mxu1 %vm443_vm1, %v7350_v25  ;;  %v5332_v59 = vpop.permute.xlu1 %5331  ;;  %v5501_v15 = vpop.permute.xlu0 %5500 }
 0x2a3   : > { %5110 = vmatpush1.msra.mxu0 %v4999_v49  ;;  %5143 = vmatprep.mubr.f32.mxu0 %v7643_v0  ;;  %v5338_v20 = vsel %vm2113_vm8, %v5332_v59, %v5334_v5  ;;  %v5337_v7 = vsel %vm2113_vm8, %v5330_v21, %v5332_v59  ;;  %v5506_v29 = vsel %vm2358_vm9, %v5499_v27, %v5501_v15 }
 0x2a4   : > { %5278 = vmatprep.subr.mxu0 %v5169_v63  ;;  %5579 = vmatprep.mubr.f32.mxu1 %v7643_v0 }
 0x2a6   : > { %7346 = vmatmul.mubr.msk.f32.vlgmr.msra.gmra.mxu0 %vm443_vm1, %v8523_v36  ;;  %v5497_v3 = vpop.permute.xlu1 %5496 }
 0x2a7   : > { %5279 = vmatpush1.msra.mxu0 %v5168_v32  ;;  %v5505_v33 = vsel %vm2358_vm9, %v5497_v3, %v5499_v27  ;;  %5312 = vmatprep.mubr.f32.mxu0 %v7643_v0 }
 0x2a8   : > { %5447 = vmatprep.subr.mxu0 %v5338_v20  ;;  %5545 = vmatprep.subr.mxu1 %v5505_v33 }
 0x2aa   : > { %7349 = vmatmul.mubr.msk.f32.vlgmr.msra.gmra.mxu0 %vm443_vm1, %v7347_v23  ;;  %v5495_v16 = vpop.permute.xlu1 %5494 }
 0x2ab   : > { %5448 = vmatpush1.msra.mxu0 %v5337_v7  ;;  %v5504_v39 = vsel %vm2358_vm9, %v5495_v16, %v5497_v3  ;;  %5481 = vmatprep.mubr.f32.mxu0 %v7643_v0 }
 0x2ac   : > { %5546 = vmatpush1.msra.mxu1 %v5504_v39 }
 0x2ad   : > { %7354 = vmatmul.mubr.msk.f32.vlgmr.msra.gmra.mxu1 %vm443_vm1, %v7353_v54 }
 0x2ae   : > { %7352 = vmatmul.mubr.msk.f32.vlgmr.msra.gmra.mxu0 %vm443_vm1, %v7350_v25  ;;  %v5503_v35 = vpop.permute.xlu1 %5502  ;;  %5800 = vmatprep.mubr.f32.mxu1 %v7643_v0 }
 0x2af   : > { %v5507_v40 = vsel %vm2358_vm9, %v5501_v15, %v5503_v35  ;;  %5650 = vmatprep.mubr.f32.mxu0 %v7643_v0 }
 0x2b0   : > { %5616 = vmatprep.subr.mxu0 %v5507_v40 }
 0x2b1   : > { %5617 = vmatpush1.msra.mxu0 %v5506_v29 }
 0x2b2   : > { %7355 = vmatmul.mubr.msk.f32.vlgmr.msra.gmra.mxu0 %vm443_vm1, %v7353_v54  ;;  %7466 = vmatprep.subr.mxu0 %v7643_v0 }
 0x2b3   : > { %7468 = vmatprep.mubr.msk.f32.mxu0 %vm7653_vm2, %v7643_v0 }
 0x30a   : > { %v2741_v14 = vpop.f32.mrf.mxu1 }
 0x30c   : > { %v2743_v6 = vpop.f32.mrf.mxu1 }
 0x30e   : > { %v2886_v47 = vpop.f32.mrf.mxu1 }
 0x30f   : > { %v2887_v46 = vadd.f32 %v2886_v47, %v2741_v14 }
 0x310   : > { %v2888_v28 = vpop.f32.mrf.mxu1 }
 0x311   : > { %v2889_v25 = vadd.f32 %v2888_v28, %v2743_v6 }
 0x312   : > { %v3051_v13 = vpop.f32.mrf.mxu1 }
 0x313   : > { %v3127_v57 = vadd.f32 %v3051_v13, %v2887_v46 }
 0x314   : > { %v3053_v62 = vpop.f32.mrf.mxu1 }
 0x315   : > { %v3128_v32 = vadd.f32 %v3053_v62, %v2889_v25 }
 0x316   : > { %v3220_v10 = vpop.f32.mrf.mxu1 }
 0x317   : > { %v3296_v4 = vadd.f32 %v3220_v10, %v3127_v57 }
 0x318   : > { %v3222_v30 = vpop.f32.mrf.mxu1 }
 0x319   : > { %v3297_v16 = vadd.f32 %v3222_v30, %v3128_v32 }
 0x31a   : > { %v3389_v22 = vpop.f32.mrf.mxu1 }
 0x31b   : > { %v3465_v52 = vadd.f32 %v3389_v22, %v3296_v4 }
 0x31c   : > { %v3391_v41 = vpop.f32.mrf.mxu1 }
 0x31d   : > { %v3466_v29 = vadd.f32 %v3391_v41, %v3297_v16 }
 0x31e   : > { %v3558_v42 = vpop.f32.mrf.mxu1 }
 0x31f   : > { %v3634_v24 = vadd.f32 %v3558_v42, %v3465_v52 }
 0x320   : > { %v3560_v43 = vpop.f32.mrf.mxu1 }
 0x321   : > { %v3635_v10 = vadd.f32 %v3560_v43, %v3466_v29 }
 0x322   : > { %v3727_v11 = vpop.f32.mrf.mxu1 }
 0x323   : > { %v2812_v26 = vpop.f32.mrf.mxu0  ;;  %v3803_v63 = vadd.f32 %v3727_v11, %v3634_v24 }
 0x324   : > { %v3729_v36 = vpop.f32.mrf.mxu1 }
 0x325   : > { %v8627_v45 = vpop.f32.mrf.mxu0 }
 0x326   : > { %v3896_v19 = vpop.f32.mrf.mxu1 }
 0x327   : > { %v2957_v50 = vpop.f32.mrf.mxu0  ;;  %v3972_v33 = vadd.f32 %v3896_v19, %v3803_v63 }
 0x328   : > { %v8625_v37 = vpop.f32.mrf.mxu1  ;;  %v2958_v40 = vadd.f32 %v2957_v50, %v2812_v26 }
 0x329   : > { %v8631_v17 = vpop.f32.mrf.mxu0 }
 0x32a   : > { %v4065_v56 = vpop.f32.mrf.mxu1 }
 0x32b   : > { %v4141_v15 = vadd.f32 %v4065_v56, %v3972_v33  ;;  %v3804_v56 = vadd.f32 %v3729_v36, %v3635_v10 }
 0x32c   : > { %v8629_v51 = vpop.f32.mrf.mxu1 }
 0x32e   : > { %v4219_v8 = vpop.f32.mrf.mxu1 }
 0x32f   : > { %v4295_v28 = vadd.f32 %v4219_v8, %v4141_v15  ;;  %v3973_v8 = vadd.f32 %v8625_v37, %v3804_v56  ;;  %v2960_v37 = vadd.f32 %v8631_v17, %v8627_v45 }
 0x330   : > { %v8635_v53 = vpop.f32.mrf.mxu1 }
 0x332   : > { %v4398_v31 = vpop.f32.mrf.mxu1 }
 0x333   : > { %v4474_v11 = vadd.f32 %v4398_v31, %v4295_v28  ;;  %v4142_v31 = vadd.f32 %v8629_v51, %v3973_v8 }
 0x334   : > { %v8641_v38 = vpop.f32.mrf.mxu1 }
 0x336   : > { %v3122_v44 = vpop.f32.mrf.mxu0 }
 0x337   : > { %v4567_v5 = vpop.f32.mrf.mxu1  ;;  %v3129_v6 = vadd.f32 %v3122_v44, %v2958_v40 }
 0x338   : > { %v8633_v55 = vpop.f32.mrf.mxu0  ;;  %v4643_v26 = vadd.f32 %v4567_v5, %v4474_v11 }
 0x339   : > { %v8647_v59 = vpop.f32.mrf.mxu1 }
 0x33a   : > { %v3291_v23 = vpop.f32.mrf.mxu0 }
 0x33b   : > { %v4736_v20 = vpop.f32.mrf.mxu1  ;;  %v3298_v62 = vadd.f32 %v3291_v23, %v3129_v6 }
 0x33c   : > { %v8637_v48 = vpop.f32.mrf.mxu0  ;;  %v4812_v25 = vadd.f32 %v4736_v20, %v4643_v26 }
 0x33d   : > { %v8653_v39 = vpop.f32.mrf.mxu1 }
 0x33e   : > { %v3460_v58 = vpop.f32.mrf.mxu0 }
 0x33f   : > { %v3467_v42 = vadd.f32 %v3460_v58, %v3298_v62 }
 0x340   : > { %v8639_v61 = vpop.f32.mrf.mxu0  ;;  %v4905_v47 = vpop.f32.mrf.mxu1 }
 0x341   : > { %v4981_v33 = vadd.f32 %v4905_v47, %v4812_v25 }
 0x342   : > { %v3629_v1 = vpop.f32.mrf.mxu0  ;;  %v4907_v30 = vpop.f32.mrf.mxu1 }
 0x343   : > { %v3636_v46 = vadd.f32 %v3629_v1, %v3467_v42 }
 0x344   : > { %v8643_v21 = vpop.f32.mrf.mxu0 }
 0x346   : > { %v3798_v9 = vpop.f32.mrf.mxu0 }
 0x347   : > { %v3805_v41 = vadd.f32 %v3798_v9, %v3636_v46 }
 0x348   : > { %v8645_v49 = vpop.f32.mrf.mxu0 }
 0x34a   : > { %v3967_v27 = vpop.f32.mrf.mxu0  ;;  %v5074_v57 = vpop.f32.mrf.mxu1 }
 0x34b   : > { %v3974_v44 = vadd.f32 %v3967_v27, %v3805_v41  ;;  %v4296_v27 = vadd.f32 %v8635_v53, %v4142_v31  ;;  %v5150_v15 = vadd.f32 %v5074_v57, %v4981_v33 }
 0x34c   : > { %v8649_v3 = vpop.f32.mrf.mxu0  ;;  %v5076_v52 = vpop.f32.mrf.mxu1 }
 0x34d   : > { %v4475_v28 = vadd.f32 %v8641_v38, %v4296_v27 }
 0x34e   : > { %v4136_v7 = vpop.f32.mrf.mxu0 }
 0x34f   : > { %v4143_v43 = vadd.f32 %v4136_v7, %v3974_v44  ;;  %v4644_v46 = vadd.f32 %v8647_v59, %v4475_v28  ;;  %v5675_v59 = vld [vmem:[%s8928_s10] sm:$0xf] }
 0x350   : > { %v8651_v54 = vpop.f32.mrf.mxu0  ;;  %v5688_v33 = vrot.slane %v5675_v59, %v2612_v12 }
 0x352   : > { %v4290_v35 = vpop.f32.mrf.mxu0 }
 0x353   : > { %v4297_v63 = vadd.f32 %v4290_v35, %v4143_v43  ;;  %v3130_v35 = vadd.f32 %v8633_v55, %v2960_v37 }
 0x354   : > { %v8655_v14 = vpop.f32.mrf.mxu0 }
 0x355   : > { %v3299_v62 = vadd.f32 %v8637_v48, %v3130_v35 }
 0x356   : > { %v4469_v13 = vpop.f32.mrf.mxu0 }
 0x357   : > { %v4476_v32 = vadd.f32 %v4469_v13, %v4297_v63  ;;  %v3468_v45 = vadd.f32 %v8639_v61, %v3299_v62 }
 0x358   : > { %v8657_v22 = vpop.f32.mrf.mxu0 }
 0x359   : > { %v5243_v24 = vpop.f32.mrf.mxu1  ;;  %v3637_v56 = vadd.f32 %v8643_v21, %v3468_v45 }
 0x35a   : > { %v4638_v19 = vpop.f32.mrf.mxu0  ;;  %v5319_v20 = vadd.f32 %v5243_v24, %v5150_v15  ;;  %v5692_v15 = vrot.slane %v5675_v59, %v2616_v18 }
 0x35b   : > { %v5245_v36 = vpop.f32.mrf.mxu1  ;;  %v4645_v9 = vadd.f32 %v4638_v19, %v4476_v32  ;;  %v5665_v19 = vpop.permute.xlu0 %5664  ;;  %v3806_v26 = vadd.f32 %v8645_v49, %v3637_v56  ;;  %v5680_v49 = vrot.slane %v5675_v59, %v2604_v2 }
 0x35c   : > { %v8659_v4 = vpop.f32.mrf.mxu0 }
 0x35d   : > { %v3975_v44 = vadd.f32 %v8649_v3, %v3806_v26 }
 0x35e   : > { %v4807_v50 = vpop.f32.mrf.mxu0 }
 0x35f   : > { %v4814_v7 = vadd.f32 %v4807_v50, %v4645_v9  ;;  %v4813_v50 = vadd.f32 %v8653_v39, %v4644_v46  ;;  %v4144_v61 = vadd.f32 %v8651_v54, %v3975_v44  ;;  %v5684_v9 = vrot.slane %v5675_v59, %v2608_v34 }
 0x360   : > { %v4809_v23 = vpop.f32.mrf.mxu0 }
 0x361   : > { %v4982_v43 = vadd.f32 %v4907_v30, %v4813_v50  ;;  %v4298_v21 = vadd.f32 %v8655_v14, %v4144_v61 }
 0x362   : > { %v4976_v58 = vpop.f32.mrf.mxu0  ;;  %v5412_v5 = vpop.f32.mrf.mxu1 }
 0x363   : > { %v4983_v51 = vadd.f32 %v4976_v58, %v4814_v7  ;;  %v5488_v47 = vadd.f32 %v5412_v5, %v5319_v20  ;;  %v5151_v24 = vadd.f32 %v5076_v52, %v4982_v43  ;;  %v4477_v25 = vadd.f32 %v8657_v22, %v4298_v21 }
 0x364   : > { %v4978_v1 = vpop.f32.mrf.mxu0  ;;  %v5414_v6 = vpop.f32.mrf.mxu1 }
 0x365   : > { %v5320_v39 = vadd.f32 %v5245_v36, %v5151_v24  ;;  %v4646_v3 = vadd.f32 %v8659_v4, %v4477_v25  ;;  %v7367_v25 = vld [vmem:[%s8923_s5 + $0x20] sm:$0xff] }
 0x366   : > { %v5145_v16 = vpop.f32.mrf.mxu0 }
 0x367   : > { %v5152_v10 = vadd.f32 %v5145_v16, %v4983_v51  ;;  %v5489_v63 = vadd.f32 %v5414_v6, %v5320_v39  ;;  %v4815_v31 = vadd.f32 %v4809_v23, %v4646_v3 }
 0x368   : > { %v5147_v40 = vpop.f32.mrf.mxu0 }
 0x369   : > { %v4984_v14 = vadd.f32 %v4978_v1, %v4815_v31 }
 0x36a   : > { %v5314_v29 = vpop.f32.mrf.mxu0 }
 0x36b   : > { %v5321_v17 = vadd.f32 %v5314_v29, %v5152_v10  ;;  %v5153_v22 = vadd.f32 %v5147_v40, %v4984_v14 }
 0x36c   : > { %v5316_v13 = vpop.f32.mrf.mxu0 }
 0x36d   : > { %v5581_v53 = vpop.f32.mrf.mxu1  ;;  %v5322_v36 = vadd.f32 %v5316_v13, %v5153_v22  ;;  %v7373_v22 = vld [vmem:[%s8923_s5 + $0x30] sm:$0xff] }
 0x36e   : > { %v5657_v42 = vadd.f32 %v5581_v53, %v5488_v47  ;;  %v5483_v11 = vpop.f32.mrf.mxu0 }
 0x36f   : > { %v5490_v41 = vadd.f32 %v5483_v11, %v5321_v17  ;;  %v5583_v58 = vpop.f32.mrf.mxu1  ;;  %v7356_v11 = vld [vmem:[%s8923_s5 + $0x8] sm:$0xff]  ;;  %v5705_v17 = vld [vmem:[%s8923_s5] sm:$0xff] }
 0x370   : > { %v5667_v57 = vadd.f32 %v5665_v19, %v5657_v42  ;;  %v5485_v55 = vpop.f32.mrf.mxu0  ;;  %v5658_v32 = vadd.f32 %v5583_v58, %v5489_v63 }
 0x371   : > { %v5491_v23 = vadd.f32 %v5485_v55, %v5322_v36 }
 0x372   : > { %7567 = vtanh.f32 %v5667_v57  ;;  %v5652_v38 = vpop.f32.mrf.mxu0  ;;  %v5668_v2 = vadd.f32 %v5665_v19, %v5658_v32 }
 0x373   : > { %v5659_v48 = vadd.f32 %v5652_v38, %v5490_v41  ;;  %v7361_v38 = vld [vmem:[%s8923_s5 + $0x10] sm:$0xff] }
 0x374   : > { %v5654_v4 = vpop.f32.mrf.mxu0 }
 0x375   : > { %v5669_v8 = vadd.f32 %v5665_v19, %v5659_v48  ;;  %v5660_v12 = vadd.f32 %v5654_v4, %v5491_v23  ;;  %v7376_v23 = vld [vmem:[%s8923_s5 + $0x38] sm:$0xff] }
 0x377   : > { %7569 = vtanh.f32 %v5669_v8  ;;  %v5670_v1 = vadd.f32 %v5665_v19, %v5660_v12  ;;  %v7364_v8 = vld [vmem:[%s8923_s5 + $0x18] sm:$0xff] }
 0x378   : > { %7571 = vtanh.f32 %v5668_v2 }
 0x379   : > { %7573 = vtanh.f32 %v5670_v1 }
 0x37f   : > { %v7568_v54 = vpop.eup %7567 }
 0x380   : > { %v8684_v30 = vmul.f32 %v7568_v54, %v5680_v49  ;;  %v7370_v54 = vld [vmem:[%s8923_s5 + $0x28] sm:$0xff] }
 0x382   : > { %5719 = vrot.lane.b32.xlu1 %v8684_v30, %s7644_s15 }
 0x384   : > { %v7570_v52 = vpop.eup %7569 }
 0x385   : > { %v8690_v16 = vmul.f32 %v7570_v52, %v5688_v33  ;;  %v7572_v5 = vpop.eup %7571 }
 0x386   : > { %6023 = vrot.lane.b32.xlu1 %v8684_v30, %s7645_s16  ;;  %v5698_v27 = vmul.f32 %v7572_v5, %v5684_v9  ;;  %v7574_v40 = vpop.eup %7573 }
 0x387   : > { %5723 = vrot.lane.b32.xlu0 %v8690_v16, %s7644_s15  ;;  %v5700_v34 = vmul.f32 %v7574_v40, %v5692_v15  ;;  %v7379_v15 = vld [vmem:[%s8923_s5 + $0x40] sm:$0xff] }
 0x38a   : > { %6186 = vrot.lane.b32.xlu1 %v8684_v30, %s7646_s22 }
 0x38b   : > { %6027 = vrot.lane.b32.xlu0 %v8690_v16, %s7645_s16 }
 0x38e   : > { %6349 = vrot.lane.b32.xlu1 %v8684_v30, %s8947_s24 }
 0x38f   : > { %6190 = vrot.lane.b32.xlu0 %v8690_v16, %s7646_s22 }
 0x392   : > { %6512 = vrot.lane.b32.xlu1 %v8684_v30, %s8944_s30 }
 0x393   : > { %6353 = vrot.lane.b32.xlu0 %v8690_v16, %s8947_s24 }
 0x396   : > { %6675 = vrot.lane.b32.xlu1 %v8684_v30, %s8945_s12 }
 0x397   : > { %6516 = vrot.lane.b32.xlu0 %v8690_v16, %s8944_s30 }
 0x39a   : > { %5721 = vrot.lane.b32.xlu1 %v5698_v27, %s7644_s15 }
 0x39b   : > { %6679 = vrot.lane.b32.xlu0 %v8690_v16, %s8945_s12 }
 0x39e   : > { %6838 = vrot.lane.b32.xlu1 %v8684_v30, %s8946_s14 }
 0x39f   : > { %6842 = vrot.lane.b32.xlu0 %v8690_v16, %s8946_s14 }
 0x3a2   : > { %6025 = vrot.lane.b32.xlu1 %v5698_v27, %s7645_s16 }
 0x3a3   : > { %5725 = vrot.lane.b32.xlu0 %v5700_v34, %s7644_s15  ;;  %s392_s15 = sand.u32 1, %s7633_s18  }
 0x3a6   : > { %6188 = vrot.lane.b32.xlu1 %v5698_v27, %s7646_s22 }
 0x3a7   : > { %7005 = vrot.lane.b32.xlu0 %v8690_v16, %s8948_s13 }
 0x3aa   : > { %6351 = vrot.lane.b32.xlu1 %v5698_v27, %s8947_s24 }
 0x3ab   : > { %6029 = vrot.lane.b32.xlu0 %v5700_v34, %s7645_s16  ;;  %s7511_s16 = smul.u32 24, %s392_s15 }
 0x3ae   : > { %6514 = vrot.lane.b32.xlu1 %v5698_v27, %s8944_s30 }
 0x3af   : > { %6192 = vrot.lane.b32.xlu0 %v5700_v34, %s7646_s22  ;;  %s7514_s22 = smul.u32 384, %s7736_s21  ;;  %s7654_s21 = smov [#allocation4]  }
 0x3b1   : > { %s8883_s25 = scalar_lea.hbm %s8929_s11, %s7514_s22 }
 0x3b2   : > { %6677 = vrot.lane.b32.xlu1 %v5698_v27, %s8945_s12 }
 0x3b3   : > { %6355 = vrot.lane.b32.xlu0 %v5700_v34, %s8947_s24  ;;  %s7178_s24 = scalar_lea.sflag [#allocation5], %s392_s15 }
 0x3b6   : > { %6840 = vrot.lane.b32.xlu1 %v5698_v27, %s8946_s14 }
 0x3b7   : > { %6518 = vrot.lane.b32.xlu0 %v5700_v34, %s8944_s30  ;;  %s394_s30 = scalar_lea.vmem [#allocation4], %s7511_s16  ;;  %s7585_s16 = sshll.u32 %s7654_s21, 4  ;;  %s7586_s16 = int_to_ptr.vmem [resolvable:$false] %s7585_s16 }
 0x3b8   : > { %s7587_s0 = scalar_lea.vmem %s7586_s16, 768 }
 0x3ba   : > { %7003 = vrot.lane.b32.xlu1 %v5698_v27, %s8948_s13 }
 0x3bb   : > { %6681 = vrot.lane.b32.xlu0 %v5700_v34, %s8945_s12  ;;  %s7192_s12 = sshll.u32 %s394_s30, 4  ;;  %s7193_s12 = int_to_ptr.vmem [resolvable:$true] %s7192_s12 }
 0x3bc   : > { %p7588_p0 = scmp.lt.s32.totalorder %s7193_s12, %s7586_s16 }
 0x3be   : > { %7001 = vrot.lane.b32.xlu1 %v8684_v30, %s8948_s13 }
 0x3bf   : > { %6844 = vrot.lane.b32.xlu0 %v5700_v34, %s8946_s14 }
 0x3c2   : > { %7165 = vperm.xlu1 %7566, %v7162_v60  }
 0x3c3   : > { %7007 = vrot.lane.b32.xlu0 %v5700_v34, %s8948_s13  ;;  %s7581_s13 = scalar_lea.vmem %s7193_s12, 384 }
 0x3c4   : > { %p7582_p11 = scmp.ne.s32.totalorder %s7193_s12, %s7581_s13  ;;  %p7589_p1 = scmp.lt.s32.totalorder %s7587_s0, %s7581_s13 }
 0x3c6   : > { %p7583_p12 = pnand %p7582_p11, %p7753_p5  ;;  %p7590_p2 = por %p7589_p1, %p7588_p0 }
 0x3c8   : > { %p7584_p13 = pneg %p7583_p12 }
 0x3ca   : > { %p7591_p3 = pnand %p7590_p2, %p7584_p13 }
 0x3f4   : > { %v5720_v18 = vpop.permute.xlu1 %5719 }
 0x3f8   : > { %v6024_v37 = vpop.permute.xlu1 %6023 }
 0x3f9   : > { %v5724_v7 = vpop.permute.xlu0 %5723 }
 0x3fc   : > { %v6187_v20 = vpop.permute.xlu1 %6186 }
 0x3fd   : > { %v6028_v29 = vpop.permute.xlu0 %6027 }
 0x400   : > { %v6350_v35 = vpop.permute.xlu1 %6349 }
 0x401   : > { %v8745_v51 = vpop.permute.xlu0 %6190 }
 0x404   : > { %v6513_v6 = vpop.permute.xlu1 %6512 }
 0x405   : > { %v8747_v28 = vpop.permute.xlu0 %6353 }
 0x408   : > { %v8749_v47 = vpop.permute.xlu1 %6675 }
 0x409   : > { %v8751_v13 = vpop.permute.xlu0 %6516 }
 0x40c   : > { %v5722_v62 = vpop.permute.xlu1 %5721 }
 0x40d   : > { %v5727_v10 = vsel %vm432_vm0, %v5720_v18, %v5722_v62  ;;  %v8754_v53 = vpop.permute.xlu0 %6679  ;;  %v5728_v42 = vsel %vm432_vm0, %v5722_v62, %v5724_v7 }
 0x40e   : > { %5766 = vmatprep.subr.mxu1 %v5728_v42 }
 0x40f   : > { %5767 = vmatpush1.msra.mxu1 %v5727_v10 }
 0x410   : > { %7357 = vmatmul.mubr.msk.f32.vlgmr.msra.gmra.mxu1 %vm443_vm1, %v7356_v11  ;;  %5910 = vmatprep.subr.mxu1 %v5698_v27  ;;  %v8761_v19 = vpop.permute.xlu1 %6838 }
 0x411   : > { %v8763_v45 = vpop.permute.xlu0 %6842  ;;  %5911 = vmatpush1.msra.mxu1 %v8684_v30  ;;  %5944 = vmatprep.mubr.f32.mxu1 %v7643_v0 }
 0x414   : > { %7359 = vmatmul.mubr.msk.f32.vlgmr.msra.gmra.mxu1 %vm443_vm1, %v5705_v17  ;;  %v6026_v46 = vpop.permute.xlu1 %6025 }
 0x415   : > { %v6031_v57 = vsel %vm888_vm3, %v6024_v37, %v6026_v46  ;;  %v5726_v55 = vpop.permute.xlu0 %5725  ;;  %v6032_v56 = vsel %vm888_vm3, %v6026_v46, %v6028_v29  ;;  %6104 = vmatprep.mubr.f32.mxu1 %v7643_v0 }
 0x416   : > { %v5729_v41 = vsel %vm432_vm0, %v5724_v7, %v5726_v55  ;;  %6070 = vmatprep.subr.mxu1 %v6032_v56 }
 0x417   : > { %7467 = vmatpush3.msra.mxu0 %v5729_v41  ;;  %6071 = vmatpush1.msra.mxu1 %v6031_v57 }
 0x418   : > { %7469 = vmatmul.mubr.msk.f32.vlgmr.msra.gmra.mxu0 %vm443_vm1, %v7356_v11  ;;  %7471 = vmatprep.subr.mxu0 %v7643_v0  ;;  %v6189_v26 = vpop.permute.xlu1 %6188 }
 0x419   : > { %7362 = vmatmul.mubr.msk.f32.vlgmr.msra.gmra.mxu1 %vm443_vm1, %v7361_v38  ;;  %v6194_v48 = vsel %vm1133_vm4, %v6187_v20, %v6189_v26  ;;  %7472 = vmatpush3.msra.mxu0 %v8690_v16  ;;  %v8783_v50 = vpop.permute.xlu0 %7005  ;;  %v6195_v44 = vsel %vm1133_vm4, %v6189_v26, %v8745_v51 }
 0x41a   : > { %6233 = vmatprep.subr.mxu1 %v6195_v44  ;;  %7473 = vmatprep.mubr.msk.f32.mxu0 %vm7653_vm2, %v7643_v0 }
 0x41b   : > { %6234 = vmatpush1.msra.mxu1 %v6194_v48  ;;  %6267 = vmatprep.mubr.f32.mxu1 %v7643_v0 }
 0x41c   : > { %7474 = vmatmul.mubr.msk.f32.vlgmr.msra.gmra.mxu0 %vm443_vm1, %v5705_v17  ;;  %v6352_v61 = vpop.permute.xlu1 %6351  ;;  %7476 = vmatprep.subr.mxu0 %v7643_v0 }
 0x41d   : > { %7365 = vmatmul.mubr.msk.f32.vlgmr.msra.gmra.mxu1 %vm443_vm1, %v7364_v8  ;;  %v6357_v43 = vsel %vm1378_vm5, %v6350_v35, %v6352_v61  ;;  %v6030_v59 = vpop.permute.xlu0 %6029  ;;  %v6358_v21 = vsel %vm1378_vm5, %v6352_v61, %v8747_v28  ;;  %7478 = vmatprep.mubr.msk.f32.mxu0 %vm7653_vm2, %v7643_v0 }
 0x41e   : > { %v6033_v24 = vsel %vm888_vm3, %v6028_v29, %v6030_v59  ;;  %6396 = vmatprep.subr.mxu1 %v6358_v21  ;;  %6430 = vmatprep.mubr.f32.mxu1 %v7643_v0 }
 0x41f   : > { %7477 = vmatpush3.msra.mxu0 %v6033_v24  ;;  %6397 = vmatpush1.msra.mxu1 %v6357_v43 }
 0x420   : > { %7479 = vmatmul.mubr.msk.f32.vlgmr.msra.gmra.mxu0 %vm443_vm1, %v7361_v38  ;;  %v6515_v49 = vpop.permute.xlu1 %6514  ;;  %7481 = vmatprep.subr.mxu0 %v7643_v0 }
 0x421   : > { %7368 = vmatmul.mubr.msk.f32.vlgmr.msra.gmra.mxu1 %vm443_vm1, %v7367_v25  ;;  %v6520_v39 = vsel %vm1623_vm6, %v6513_v6, %v6515_v49  ;;  %v6193_v3 = vpop.permute.xlu0 %6192  ;;  %v6521_v58 = vsel %vm1623_vm6, %v6515_v49, %v8751_v13  ;;  %7483 = vmatprep.mubr.msk.f32.mxu0 %vm7653_vm2, %v7643_v0 }
 0x422   : > { %v6196_v63 = vsel %vm1133_vm4, %v8745_v51, %v6193_v3  ;;  %6559 = vmatprep.subr.mxu1 %v6521_v58  ;;  %6593 = vmatprep.mubr.f32.mxu1 %v7643_v0 }
 0x423   : > { %7482 = vmatpush3.msra.mxu0 %v6196_v63  ;;  %6560 = vmatpush1.msra.mxu1 %v6520_v39 }
 0x424   : > { %7484 = vmatmul.mubr.msk.f32.vlgmr.msra.gmra.mxu0 %vm443_vm1, %v7364_v8  ;;  %v6678_v31 = vpop.permute.xlu1 %6677  ;;  %7486 = vmatprep.subr.mxu0 %v7643_v0 }
 0x425   : > { %7371 = vmatmul.mubr.msk.f32.vlgmr.msra.gmra.mxu1 %vm443_vm1, %v7370_v54  ;;  %v6683_v30 = vsel %vm1868_vm7, %v8749_v47, %v6678_v31  ;;  %v6356_v32 = vpop.permute.xlu0 %6355  ;;  %v6684_v33 = vsel %vm1868_vm7, %v6678_v31, %v8754_v53  ;;  %7488 = vmatprep.mubr.msk.f32.mxu0 %vm7653_vm2, %v7643_v0 }
 0x426   : > { %v6359_v14 = vsel %vm1378_vm5, %v8747_v28, %v6356_v32  ;;  %6722 = vmatprep.subr.mxu1 %v6684_v33  ;;  %6756 = vmatprep.mubr.f32.mxu1 %v7643_v0 }
 0x427   : > { %7487 = vmatpush3.msra.mxu0 %v6359_v14  ;;  %6723 = vmatpush1.msra.mxu1 %v6683_v30 }
 0x428   : > { %7489 = vmatmul.mubr.msk.f32.vlgmr.msra.gmra.mxu0 %vm443_vm1, %v7367_v25  ;;  %v6841_v52 = vpop.permute.xlu1 %6840  ;;  %7491 = vmatprep.subr.mxu0 %v7643_v0 }
 0x429   : > { %7374 = vmatmul.mubr.msk.f32.vlgmr.msra.gmra.mxu1 %vm443_vm1, %v7373_v22  ;;  %v6846_v2 = vsel %vm2113_vm8, %v8761_v19, %v6841_v52  ;;  %v6519_v36 = vpop.permute.xlu0 %6518  ;;  %v6847_v16 = vsel %vm2113_vm8, %v6841_v52, %v8763_v45  ;;  %7493 = vmatprep.mubr.msk.f32.mxu0 %vm7653_vm2, %v7643_v0 }
 0x42a   : > { %v6522_v4 = vsel %vm1623_vm6, %v8751_v13, %v6519_v36  ;;  %6885 = vmatprep.subr.mxu1 %v6847_v16  ;;  %6919 = vmatprep.mubr.f32.mxu1 %v7643_v0 }
 0x42b   : > { %7492 = vmatpush3.msra.mxu0 %v6522_v4  ;;  %6886 = vmatpush1.msra.mxu1 %v6846_v2 }
 0x42c   : > { %7494 = vmatmul.mubr.msk.f32.vlgmr.msra.gmra.mxu0 %vm443_vm1, %v7370_v54  ;;  %v7004_v12 = vpop.permute.xlu1 %7003  ;;  %7496 = vmatprep.subr.mxu0 %v7643_v0 }
 0x42d   : > { %7377 = vmatmul.mubr.msk.f32.vlgmr.msra.gmra.mxu1 %vm443_vm1, %v7376_v23  ;;  %v6682_v1 = vpop.permute.xlu0 %6681  ;;  %v7010_v9 = vsel %vm2358_vm9, %v7004_v12, %v8783_v50  ;;  %7498 = vmatprep.mubr.msk.f32.mxu0 %vm7653_vm2, %v7643_v0 }
 0x42e   : > { %v6685_v5 = vsel %vm1868_vm7, %v8754_v53, %v6682_v1  ;;  %7048 = vmatprep.subr.mxu1 %v7010_v9  ;;  %7082 = vmatprep.mubr.f32.mxu1 %v7643_v0 }
 0x42f   : > { %7497 = vmatpush3.msra.mxu0 %v6685_v5 }
 0x430   : > { %7499 = vmatmul.mubr.msk.f32.vlgmr.msra.gmra.mxu0 %vm443_vm1, %v7373_v22  ;;  %v7002_v27 = vpop.permute.xlu1 %7001  ;;  %7501 = vmatprep.subr.mxu0 %v7643_v0 }
 0x431   : > { %v7009_v40 = vsel %vm2358_vm9, %v7002_v27, %v7004_v12  ;;  %v6845_v34 = vpop.permute.xlu0 %6844  ;;  %7503 = vmatprep.mubr.msk.f32.mxu0 %vm7653_vm2, %v7643_v0 }
 0x432   : > { %v6848_v60 = vsel %vm2113_vm8, %v8763_v45, %v6845_v34  ;;  %7049 = vmatpush1.msra.mxu1 %v7009_v40 }
 0x433   : > { %7502 = vmatpush3.msra.mxu0 %v6848_v60  ;;  %7380 = vmatmul.mubr.msk.f32.vlgmr.msra.gmra.mxu1 %vm443_vm1, %v7379_v15 }
 0x434   : > { %7504 = vmatmul.mubr.msk.f32.vlgmr.msra.gmra.mxu0 %vm443_vm1, %v7376_v23  ;;  %7506 = vmatprep.subr.mxu0 %v7643_v0 }
 0x435   : > { %v7008_v18 = vpop.permute.xlu0 %7007  ;;  %7508 = vmatprep.mubr.msk.f32.mxu0 %vm7653_vm2, %v7643_v0 }
 0x436   : > { %v7011_v37 = vsel %vm2358_vm9, %v8783_v50, %v7008_v18 }
 0x437   : > { %7507 = vmatpush3.msra.mxu0 %v7011_v37 }
 0x438   : > { %7509 = vmatmul.mubr.msk.f32.vlgmr.msra.gmra.mxu0 %vm443_vm1, %v7379_v15 }
 0x43d   : > { %v7166_v36 = vpop.permute.xlu1 %7165 }
 0x4d0   : > { %v5802_v7 = vpop.f32.mrf.mxu1 }
 0x4d2   : > { %v5804_v20 = vpop.f32.mrf.mxu1 }
 0x4d4   : > { %v5946_v29 = vpop.f32.mrf.mxu1 }
 0x4d5   : > { %v5947_v45 = vadd.f32 %v5946_v29, %v5802_v7 }
 0x4d6   : > { %v5948_v35 = vpop.f32.mrf.mxu1 }
 0x4d7   : > { %v5949_v56 = vadd.f32 %v5948_v35, %v5804_v20 }
 0x4d8   : > { %v5873_v51 = vpop.f32.mrf.mxu0 }
 0x4d9   : > { %v6106_v6 = vpop.f32.mrf.mxu1 }
 0x4da   : > { %v7470_v28 = vpop.f32.mrf.mxu0  ;;  %v6181_v41 = vadd.f32 %v6106_v6, %v5947_v45 }
 0x4db   : > { %v6108_v47 = vpop.f32.mrf.mxu1 }
 0x4dc   : > { %v6017_v13 = vpop.f32.mrf.mxu0  ;;  %v6182_v48 = vadd.f32 %v6108_v47, %v5949_v56 }
 0x4dd   : > { %v6269_v62 = vpop.f32.mrf.mxu1  ;;  %v6018_v8 = vadd.f32 %v6017_v13, %v5873_v51 }
 0x4de   : > { %v7475_v10 = vpop.f32.mrf.mxu0  ;;  %v6344_v50 = vadd.f32 %v6269_v62, %v6181_v41 }
 0x4df   : > { %v6271_v53 = vpop.f32.mrf.mxu1 }
 0x4e0   : > { %v6177_v42 = vpop.f32.mrf.mxu0  ;;  %v6345_v43 = vadd.f32 %v6271_v53, %v6182_v48 }
 0x4e1   : > { %v6432_v0 = vpop.f32.mrf.mxu1  ;;  %v6183_v24 = vadd.f32 %v6177_v42, %v6018_v8 }
 0x4e2   : > { %v7480_v11 = vpop.f32.mrf.mxu0  ;;  %v6507_v59 = vadd.f32 %v6432_v0, %v6344_v50 }
 0x4e3   : > { %v6434_v19 = vpop.f32.mrf.mxu1 }
 0x4e4   : > { %v6340_v17 = vpop.f32.mrf.mxu0  ;;  %v6508_v49 = vadd.f32 %v6434_v19, %v6345_v43 }
 0x4e5   : > { %v6595_v46 = vpop.f32.mrf.mxu1  ;;  %v6346_v58 = vadd.f32 %v6340_v17, %v6183_v24 }
 0x4e6   : > { %v7485_v57 = vpop.f32.mrf.mxu0  ;;  %v6670_v39 = vadd.f32 %v6595_v46, %v6507_v59 }
 0x4e7   : > { %v6597_v55 = vpop.f32.mrf.mxu1 }
 0x4e8   : > { %v6503_v38 = vpop.f32.mrf.mxu0  ;;  %v6671_v63 = vadd.f32 %v6597_v55, %v6508_v49 }
 0x4e9   : > { %v6758_v26 = vpop.f32.mrf.mxu1  ;;  %v6509_v30 = vadd.f32 %v6503_v38, %v6346_v58 }
 0x4ea   : > { %v7490_v44 = vpop.f32.mrf.mxu0  ;;  %v6833_v54 = vadd.f32 %v6758_v26, %v6670_v39 }
 0x4eb   : > { %v6760_v61 = vpop.f32.mrf.mxu1 }
 0x4ec   : > { %v6666_v21 = vpop.f32.mrf.mxu0  ;;  %v6834_v33 = vadd.f32 %v6760_v61, %v6671_v63 }
 0x4ed   : > { %v6921_v25 = vpop.f32.mrf.mxu1  ;;  %v6672_v52 = vadd.f32 %v6666_v21, %v6509_v30 }
 0x4ee   : > { %v7495_v3 = vpop.f32.mrf.mxu0  ;;  %v6996_v14 = vadd.f32 %v6921_v25, %v6833_v54 }
 0x4ef   : > { %v6923_v32 = vpop.f32.mrf.mxu1 }
 0x4f0   : > { %v6829_v31 = vpop.f32.mrf.mxu0  ;;  %v6997_v16 = vadd.f32 %v6923_v32, %v6834_v33 }
 0x4f1   : > { %v6835_v12 = vadd.f32 %v6829_v31, %v6672_v52 }
 0x4f2   : > { %v7500_v22 = vpop.f32.mrf.mxu0 }
 0x4f3   : > { %v7084_v2 = vpop.f32.mrf.mxu1 }
 0x4f4   : > { %v7159_v4 = vadd.f32 %v7084_v2, %v6996_v14  ;;  %v6992_v23 = vpop.f32.mrf.mxu0 }
 0x4f5   : > { %v7086_v1 = vpop.f32.mrf.mxu1  ;;  %v6998_v15 = vadd.f32 %v6992_v23, %v6835_v12 }
 0x4f6   : > { %v7160_v9 = vadd.f32 %v7086_v1, %v6997_v16  ;;  %v7168_v5 = vadd.f32 %v7166_v36, %v7159_v4  ;;  %v7505_v27 = vpop.f32.mrf.mxu0 }
 0x4f8   : > { %v7169_v40 = vadd.f32 %v7166_v36, %v7160_v9  ;;  %7575 = vtanh.f32 %v7168_v5  ;;  %v7155_v34 = vpop.f32.mrf.mxu0 }
 0x4f9   : > { %v7161_v60 = vadd.f32 %v7155_v34, %v6998_v15 }
 0x4fa   : > { %7577 = vtanh.f32 %v7169_v40  ;;  %v7510_v18 = vpop.f32.mrf.mxu0 }
 0x4fb   : > { %v7170_v37 = vadd.f32 %v7166_v36, %v7161_v60 }
 0x4fd   : > { %7579 = vtanh.f32 %v7170_v37 }
 0x505   : > { %v7576_v7 = vpop.eup %7575 }
 0x506   : > { %7174 = vst [vmem:[%s394_s30] sm:$0xff] %v7576_v7 }
 0x507   : > { %v7578_v20 = vpop.eup %7577 }
 0x508   : > { %7175 = vst [vmem:[%s394_s30 + $0x8] sm:$0xff] %v7578_v20 }
 0x50a   : > { %v7580_v29 = vpop.eup %7579 }
 0x50b   : > { %7176 = vst [vmem:[%s394_s30 + $0x10] sm:$0xff] %v7580_v29 }
 0x50c   : > { %7594 = shalt.err (!%p7591_p3)
}
 0x50d   : > { %s7595_s22 = scalar_lea.hbm %s8883_s25, 384  ;;  %s7599_s14 = scalar_lea.hbm %s8929_s11, 768 }
 0x50e   : > { %p7596_p4 = scmp.ne.s32.totalorder %s8883_s25, %s7595_s22  ;;  %p7600_p9 = scmp.lt.s32.totalorder %s8883_s25, %s8929_s11 }
 0x50f   : > { %p7601_p10 = scmp.lt.s32.totalorder %s7599_s14, %s7595_s22 }
 0x510   : > { %p7597_p7 = pnand %p7596_p4, %p7753_p5 }
 0x511   : > { %p7602_p11 = por %p7601_p10, %p7600_p9 }
 0x512   : > { %p7598_p8 = pneg %p7597_p7 }
 0x514   : > { %p7603_p12 = pnand %p7602_p11, %p7598_p8 }
 0x516   : > { %7606 = shalt.err (!%p7603_p12)
}
 0x517   : > { %7515 = dma.vmem_to_hbm [thread:$0]  (%p7753_p5), %s7193_s12, 384, %s8883_s25, %s7178_s24  }
 0x518 PF: > { %p7521_p13 = scmp.ge.s32.totalorder %s7641_s20, 2  ;;  %s7204_s0 = sand.u32 1, %s7629_s17  }
 0x519   : > { %s7205_s13 = scalar_lea.sflag [#allocation5], %s7204_s0 }
 0x51a   : > { %p7518_p0 = pnand %p7521_p13, %p7757_p6 }
 0x51c   : > { %p7519_p1 = pneg %p7518_p0 }
 0x51e   : > { %7624 = dma.done.wait (%p7519_p1), %s7205_s13, 384  }
 0x51f   : > { %7626 = vsyncadd (%p7519_p1), %s7205_s13, 4294966912  ;;  %p21_p2 = scmp.ge.s32.totalorder %s7740_s23, 4   ;;  %s8949_s17 = smov %s7633_s18 }
 0x520   : > { %s8950_s18 = smov %s7637_s19  ;;  %s8951_s19 = smov %s7751_s26 }
 0x521   : > { %s8952_s20 = smov %s7740_s23  ;;  %23 = sbr.rel (!%p21_p2) target bundleno = 5 (0x5), region = 134 }
 0x526   :  { %7210 = vsyncpa [#allocation5], 1 }
 0x527   :  { %7212 = vsyncpa [#allocation5 + $0x1], 1 }

</bundles_post_ra>
